<compile_context>
chip_gen: v7x
topology: tpu7x:2x2x1
jax: 0.10.0
libtpu: 0.0.40
codegen_flags: <defaults>
</compile_context>

<pallas_src>
import functools

import jax
import jax.numpy as jnp
from jax.experimental import pallas as pl
from jax.experimental.pallas import tpu as pltpu

BN_EPS = 1e-5
# bf16 operands feed the v6e/v7x MXU at full rate and halve weight/patch DMA;
# accumulation is always f32 (preferred_element_type).
MATMUL_DTYPE = jnp.bfloat16


def _full_spec(shape):
    """BlockSpec covering the whole (small) array; grid is a single step."""
    return pl.BlockSpec(shape, lambda i, _n=len(shape): (0,) * _n)


# ----------------------------------------------------------------------------
# In-kernel helpers (pure jnp on traced values)
# ----------------------------------------------------------------------------
def _bn_relu(y, gamma, beta):
    """BatchNorm1d (training-mode stats over rows, biased variance, two-pass)
    fused with ReLU.  y is f32."""
    mean = jnp.mean(y, axis=0, keepdims=True)
    d = y - mean
    var = jnp.mean(d * d, axis=0, keepdims=True)
    scale = gamma * jax.lax.rsqrt(var + BN_EPS)
    return jnp.maximum(d * scale + beta, 0.0)


def _maxpool2(y, even_sel):
    """MaxPool1d(kernel=2, stride=2) along rows: pairwise max via an XLU roll,
    then ONE half-size even-row extraction matmul (even_sel precomputed 0/1).
    Pairs never cross batch elements because every per-sample length is even."""
    rows = y.shape[0]
    paired = jnp.maximum(y, pltpu.roll(y, rows - 1, 0))   # row l vs row l+1
    return jnp.dot(even_sel, paired, preferred_element_type=jnp.float32)


def _conv3_same(x, w_stacked, bias, length):
    """k=3, stride=1, 'same' Conv1d on an (N*L, Cin) f32 activation.
    Shifts ride the XLU (pltpu.roll) with a VPU boundary mask (zero padding at
    every sample's boundary); the three taps are concatenated on the lane axis
    so the MXU sees a single K=3*Cin contraction.
    w_stacked = [W_tap0; W_tap1; W_tap2] of shape (3*Cin, Cout)."""
    rows = x.shape[0]
    i = jax.lax.broadcasted_iota(jnp.int32, x.shape, 0)
    if length & (length - 1) == 0:                       # L is a power of two
        lpos = jax.lax.bitwise_and(i, length - 1)
    else:
        lpos = jax.lax.rem(i, length)
    x_prev = jnp.where(lpos != 0, pltpu.roll(x, 1, 0), 0.0)
    x_next = jnp.where(lpos != length - 1, pltpu.roll(x, rows - 1, 0), 0.0)
    taps = jnp.concatenate([x_prev, x, x_next], axis=-1).astype(MATMUL_DTYPE)
    y = jnp.dot(taps, w_stacked, preferred_element_type=jnp.float32)
    return y + bias


# ----------------------------------------------------------------------------
# Fused Pallas kernel: cbrm1..cbrm5 + FC head + softmax
# ----------------------------------------------------------------------------
def wdcnn_kernel(p1_ref,
                 w1_ref, b1_ref, g1_ref, be1_ref, pe1_ref,
                 w2_ref, b2_ref, g2_ref, be2_ref, pe2_ref,
                 w3_ref, b3_ref, g3_ref, be3_ref, pe3_ref,
                 w4_ref, b4_ref, g4_ref, be4_ref, pe4_ref,
                 w5_ref, b5_ref, g5_ref, be5_ref, pe5_ref,
                 fe_ref, fo_ref,
                 wf1_ref, bf1_ref, wf2_ref, bf2_ref,
                 o_ref):
    n = o_ref.shape[0]

    # --- cbrm1: Conv1d(1,16,k=64,s=16,p=24) via precomputed im2col patches ---
    y = jnp.dot(p1_ref[...], w1_ref[...],
                preferred_element_type=jnp.float32) + b1_ref[...]
    x = _maxpool2(_bn_relu(y, g1_ref[...], be1_ref[...]), pe1_ref[...])   # (N*32,16)

    # --- cbrm2..cbrm5: k=3 'same' convs, all VMEM-resident ---
    for w_ref, b_ref, g_ref, be_ref, pe_ref in (
            (w2_ref, b2_ref, g2_ref, be2_ref, pe2_ref),
            (w3_ref, b3_ref, g3_ref, be3_ref, pe3_ref),
            (w4_ref, b4_ref, g4_ref, be4_ref, pe4_ref),
            (w5_ref, b5_ref, g5_ref, be5_ref, pe5_ref)):
        length = x.shape[0] // n
        y = _conv3_same(x, w_ref[...], b_ref[...], length)
        x = _maxpool2(_bn_relu(y, g_ref[...], be_ref[...]), pe_ref[...])

    # x: (N*2, 64).  PyTorch's x.view(N, -1) on (N, 64, 2) is channel-major
    # (feature 2*c + l); the kernel builds features as f' = 64*l + c via an
    # even/odd row split + lane concat, and FC1's weight rows were permuted
    # accordingly in the wrapper -> one K=128 matmul.
    a0 = jnp.dot(fe_ref[...], x, preferred_element_type=jnp.float32)   # l == 0
    a1 = jnp.dot(fo_ref[...], x, preferred_element_type=jnp.float32)   # l == 1
    feat = jnp.concatenate([a0, a1], axis=-1).astype(MATMUL_DTYPE)     # (N, 128)

    h = jnp.dot(feat, wf1_ref[...],
                preferred_element_type=jnp.float32) + bf1_ref[...]
    h = jnp.maximum(h, 0.0).astype(MATMUL_DTYPE)
    logits = jnp.dot(h, wf2_ref[...],
                     preferred_element_type=jnp.float32) + bf2_ref[...]

    m = jnp.max(logits, axis=1, keepdims=True)
    e = jnp.exp(logits - m)
    o_ref[...] = e / jnp.sum(e, axis=1, keepdims=True)     # exact softmax rows


# ----------------------------------------------------------------------------
# JAX glue: stage-1 im2col, weight packing, selection matrices, pallas_call
# ----------------------------------------------------------------------------
def _stage1_patches(x):
    """im2col for Conv1d(1, 16, k=64, stride=16, pad=24); x is (N, 1, L) NCL."""
    n, _, length = x.shape
    k, stride, pad = 64, 16, 24
    xp = jnp.pad(x[:, 0, :], ((0, 0), (pad, pad)))
    l_out = (length + 2 * pad - k) // stride + 1
    idx = jnp.arange(l_out)[:, None] * stride + jnp.arange(k)[None, :]
    patches = xp[:, idx]                             # (N, L_out, K)
    return patches.reshape(n * l_out, k), l_out      # (N*L_out, K), Cin == 1


def _stack_k3_weight(conv_w):
    """(Cout, Cin, 3) -> (3*Cin, Cout), taps stacked [x[l-1]; x[l]; x[l+1]]."""
    return jnp.concatenate([conv_w[:, :, t].T for t in range(3)], axis=0)


def _even_select_mat(rows):
    i = jnp.arange(rows // 2)[:, None]
    j = jnp.arange(rows)[None, :]
    return (j == 2 * i).astype(jnp.float32)


def _odd_select_mat(rows):
    i = jnp.arange(rows // 2)[:, None]
    j = jnp.arange(rows)[None, :]
    return (j == 2 * i + 1).astype(jnp.float32)


def wdcnn_forward(params, x):
    n = x.shape[0]
    num_classes = params["fc2"][0].shape[0]

    def row(v):
        return v.reshape(1, -1).astype(jnp.float32)

    patches, l1 = _stage1_patches(x)
    patches = patches.astype(MATMUL_DTYPE)                      # (N*64, 64)
    w1c, b1c, g1, be1 = params["cbrm1"]
    w1m = w1c.reshape(w1c.shape[0], -1).T.astype(MATMUL_DTYPE)  # (64, 16)

    rows = n * l1                                               # conv-1 output rows
    args = [patches, w1m, row(b1c), row(g1), row(be1), _even_select_mat(rows)]
    rows //= 2
    for name in ("cbrm2", "cbrm3", "cbrm4", "cbrm5"):
        wc, bc, g, be = params[name]
        args += [_stack_k3_weight(wc).astype(MATMUL_DTYPE),
                 row(bc), row(g), row(be),
                 _even_select_mat(rows)]                        # stage-k pool extractor
        rows //= 2
    # rows == 2*n: final activation stored as (2N, 64) rows; flatten extractors.
    args += [_even_select_mat(2 * n), _odd_select_mat(2 * n)]

    w_fc1, b_fc1 = params["fc1"]
    w_fc2, b_fc2 = params["fc2"]
    # Permute FC1 rows so feature f' = 64*l + c matches the kernel's concat order
    # (PyTorch flatten order is f = 2*c + l).  Done once on the weight: free.
    wf1p = jnp.transpose(w_fc1.T.reshape(64, 2, -1), (1, 0, 2)).reshape(128, -1)
    args += [wf1p.astype(MATMUL_DTYPE), row(b_fc1),
             w_fc2.T.astype(MATMUL_DTYPE), row(b_fc2)]

    return pl.pallas_call(
        wdcnn_kernel,
        out_shape=jax.ShapeDtypeStruct((n, num_classes), jnp.float32),
        grid=(1,),
        in_specs=[_full_spec(a.shape) for a in args],
        out_specs=_full_spec((n, num_classes)),
        compiler_params=pltpu.CompilerParams(
            dimension_semantics=("arbitrary",),
            # Explicit scoped-VMEM budget (default is only 16 MiB on v5e);
            # safe on v7x's 64 MiB physical VMEM as well.
            vmem_limit_bytes=32 * 1024 * 1024),
    )(*args)


# ----------------------------------------------------------------------------
# Deterministic parameter init (same shapes as the PyTorch module's __init__)
# ----------------------------------------------------------------------------
def init_params(key, num_classes=10):
    ks = jax.random.split(key, 7)

    def conv_init(k, cout, cin, ksz):
        bound = (cin * ksz) ** -0.5
        kw, kb = jax.random.split(k)
        w = jax.random.uniform(kw, (cout, cin, ksz), jnp.float32, -bound, bound)
        b = jax.random.uniform(kb, (cout,), jnp.float32, -bound, bound)
        gamma = jnp.ones((cout,), jnp.float32)     # BatchNorm1d default init
        beta = jnp.zeros((cout,), jnp.float32)
        return (w, b, gamma, beta)

    def linear_init(k, out_f, in_f):
        bound = in_f ** -0.5
        kw, kb = jax.random.split(k)
        w = jax.random.uniform(kw, (out_f, in_f), jnp.float32, -bound, bound)
        b = jax.random.uniform(kb, (out_f,), jnp.float32, -bound, bound)
        return (w, b)

    return {
        "cbrm1": conv_init(ks[0], 16, 1, 64),
        "cbrm2": conv_init(ks[1], 32, 16, 3),
        "cbrm3": conv_init(ks[2], 64, 32, 3),
        "cbrm4": conv_init(ks[3], 64, 64, 3),
        "cbrm5": conv_init(ks[4], 64, 64, 3),
        "fc1": linear_init(ks[5], 100, 128),
        "fc2": linear_init(ks[6], num_classes, 100),
    }


if __name__ == "__main__":
    key = jax.random.PRNGKey(0)
    kx, kp = jax.random.split(key)
    # Length 1024 is what the module implies: cbrm1..5 -> (N, 64, 2) -> 128 features.
    x = jax.random.normal(kx, (2, 1, 1024), jnp.float32)
    params = init_params(kp, num_classes=10)

    fwd = jax.jit(functools.partial(wdcnn_forward, params))
    out = jax.block_until_ready(fwd(x))

    assert out.shape == (2, 10), out.shape
    assert bool(jnp.all(jnp.isfinite(out)))
    assert bool(jnp.allclose(jnp.sum(out, axis=1), 1.0, atol=1e-3))
    print("KERNEL_OK")
</pallas_src>

<mosaic_0001>
module attributes {stable_mosaic.version = 11 : i64} {
  func.func @wdcnn_kernel(%arg0: i32, %arg1: memref<128x64xbf16, #tpu.memory_space<vmem>>, %arg2: memref<64x16xbf16, #tpu.memory_space<vmem>>, %arg3: memref<1x16xf32, #tpu.memory_space<vmem>>, %arg4: memref<1x16xf32, #tpu.memory_space<vmem>>, %arg5: memref<1x16xf32, #tpu.memory_space<vmem>>, %arg6: memref<64x128xf32, #tpu.memory_space<vmem>>, %arg7: memref<48x32xbf16, #tpu.memory_space<vmem>>, %arg8: memref<1x32xf32, #tpu.memory_space<vmem>>, %arg9: memref<1x32xf32, #tpu.memory_space<vmem>>, %arg10: memref<1x32xf32, #tpu.memory_space<vmem>>, %arg11: memref<32x64xf32, #tpu.memory_space<vmem>>, %arg12: memref<96x64xbf16, #tpu.memory_space<vmem>>, %arg13: memref<1x64xf32, #tpu.memory_space<vmem>>, %arg14: memref<1x64xf32, #tpu.memory_space<vmem>>, %arg15: memref<1x64xf32, #tpu.memory_space<vmem>>, %arg16: memref<16x32xf32, #tpu.memory_space<vmem>>, %arg17: memref<192x64xbf16, #tpu.memory_space<vmem>>, %arg18: memref<1x64xf32, #tpu.memory_space<vmem>>, %arg19: memref<1x64xf32, #tpu.memory_space<vmem>>, %arg20: memref<1x64xf32, #tpu.memory_space<vmem>>, %arg21: memref<8x16xf32, #tpu.memory_space<vmem>>, %arg22: memref<192x64xbf16, #tpu.memory_space<vmem>>, %arg23: memref<1x64xf32, #tpu.memory_space<vmem>>, %arg24: memref<1x64xf32, #tpu.memory_space<vmem>>, %arg25: memref<1x64xf32, #tpu.memory_space<vmem>>, %arg26: memref<4x8xf32, #tpu.memory_space<vmem>>, %arg27: memref<2x4xf32, #tpu.memory_space<vmem>>, %arg28: memref<2x4xf32, #tpu.memory_space<vmem>>, %arg29: memref<128x100xbf16, #tpu.memory_space<vmem>>, %arg30: memref<1x100xf32, #tpu.memory_space<vmem>>, %arg31: memref<100x10xbf16, #tpu.memory_space<vmem>>, %arg32: memref<1x10xf32, #tpu.memory_space<vmem>>, %arg33: memref<2x10xf32, #tpu.memory_space<vmem>>) attributes {dimension_semantics = [#tpu.dimension_semantics<arbitrary>], iteration_bounds = array<i64: 1>, scalar_prefetch = 0 : i64, scratch_operands = 0 : i64, tpu.core_type = #tpu.core_type<tc>, window_params = [{pipeline_mode = #tpu.pipeline_mode<synchronous>, transform_indices = @transform_0, window_bounds = array<i64: 128, 64>}, {pipeline_mode = #tpu.pipeline_mode<synchronous>, transform_indices = @transform_1, window_bounds = array<i64: 64, 16>}, {pipeline_mode = #tpu.pipeline_mode<synchronous>, transform_indices = @transform_2, window_bounds = array<i64: 1, 16>}, {pipeline_mode = #tpu.pipeline_mode<synchronous>, transform_indices = @transform_3, window_bounds = array<i64: 1, 16>}, {pipeline_mode = #tpu.pipeline_mode<synchronous>, transform_indices = @transform_4, window_bounds = array<i64: 1, 16>}, {pipeline_mode = #tpu.pipeline_mode<synchronous>, transform_indices = @transform_5, window_bounds = array<i64: 64, 128>}, {pipeline_mode = #tpu.pipeline_mode<synchronous>, transform_indices = @transform_6, window_bounds = array<i64: 48, 32>}, {pipeline_mode = #tpu.pipeline_mode<synchronous>, transform_indices = @transform_7, window_bounds = array<i64: 1, 32>}, {pipeline_mode = #tpu.pipeline_mode<synchronous>, transform_indices = @transform_8, window_bounds = array<i64: 1, 32>}, {pipeline_mode = #tpu.pipeline_mode<synchronous>, transform_indices = @transform_9, window_bounds = array<i64: 1, 32>}, {pipeline_mode = #tpu.pipeline_mode<synchronous>, transform_indices = @transform_10, window_bounds = array<i64: 32, 64>}, {pipeline_mode = #tpu.pipeline_mode<synchronous>, transform_indices = @transform_11, window_bounds = array<i64: 96, 64>}, {pipeline_mode = #tpu.pipeline_mode<synchronous>, transform_indices = @transform_12, window_bounds = array<i64: 1, 64>}, {pipeline_mode = #tpu.pipeline_mode<synchronous>, transform_indices = @transform_13, window_bounds = array<i64: 1, 64>}, {pipeline_mode = #tpu.pipeline_mode<synchronous>, transform_indices = @transform_14, window_bounds = array<i64: 1, 64>}, {pipeline_mode = #tpu.pipeline_mode<synchronous>, transform_indices = @transform_15, window_bounds = array<i64: 16, 32>}, {pipeline_mode = #tpu.pipeline_mode<synchronous>, transform_indices = @transform_16, window_bounds = array<i64: 192, 64>}, {pipeline_mode = #tpu.pipeline_mode<synchronous>, transform_indices = @transform_17, window_bounds = array<i64: 1, 64>}, {pipeline_mode = #tpu.pipeline_mode<synchronous>, transform_indices = @transform_18, window_bounds = array<i64: 1, 64>}, {pipeline_mode = #tpu.pipeline_mode<synchronous>, transform_indices = @transform_19, window_bounds = array<i64: 1, 64>}, {pipeline_mode = #tpu.pipeline_mode<synchronous>, transform_indices = @transform_20, window_bounds = array<i64: 8, 16>}, {pipeline_mode = #tpu.pipeline_mode<synchronous>, transform_indices = @transform_21, window_bounds = array<i64: 192, 64>}, {pipeline_mode = #tpu.pipeline_mode<synchronous>, transform_indices = @transform_22, window_bounds = array<i64: 1, 64>}, {pipeline_mode = #tpu.pipeline_mode<synchronous>, transform_indices = @transform_23, window_bounds = array<i64: 1, 64>}, {pipeline_mode = #tpu.pipeline_mode<synchronous>, transform_indices = @transform_24, window_bounds = array<i64: 1, 64>}, {pipeline_mode = #tpu.pipeline_mode<synchronous>, transform_indices = @transform_25, window_bounds = array<i64: 4, 8>}, {pipeline_mode = #tpu.pipeline_mode<synchronous>, transform_indices = @transform_26, window_bounds = array<i64: 2, 4>}, {pipeline_mode = #tpu.pipeline_mode<synchronous>, transform_indices = @transform_27, window_bounds = array<i64: 2, 4>}, {pipeline_mode = #tpu.pipeline_mode<synchronous>, transform_indices = @transform_28, window_bounds = array<i64: 128, 100>}, {pipeline_mode = #tpu.pipeline_mode<synchronous>, transform_indices = @transform_29, window_bounds = array<i64: 1, 100>}, {pipeline_mode = #tpu.pipeline_mode<synchronous>, transform_indices = @transform_30, window_bounds = array<i64: 100, 10>}, {pipeline_mode = #tpu.pipeline_mode<synchronous>, transform_indices = @transform_31, window_bounds = array<i64: 1, 10>}, {pipeline_mode = #tpu.pipeline_mode<synchronous>, transform_indices = @transform_32, window_bounds = array<i64: 2, 10>}]} {
    %c0 = arith.constant 0 : index
    %c0_0 = arith.constant 0 : index
    %0 = vector.load %arg1[%c0, %c0_0] : memref<128x64xbf16, #tpu.memory_space<vmem>>, vector<128x64xbf16>
    %c0_1 = arith.constant 0 : index
    %c0_2 = arith.constant 0 : index
    %1 = vector.load %arg2[%c0_1, %c0_2] : memref<64x16xbf16, #tpu.memory_space<vmem>>, vector<64x16xbf16>
    %cst = arith.constant dense<0.000000e+00> : vector<128x16xf32>
    %2 = tpu.matmul %0, %1, %cst {dimension_numbers = #tpu.dot_dimension_numbers<[1], [0], [0], [1], [0, 0, 1, 1], [], []>} : vector<128x64xbf16>, vector<64x16xbf16>, vector<128x16xf32> -> vector<128x16xf32>
    %c0_3 = arith.constant 0 : index
    %c0_4 = arith.constant 0 : index
    %3 = vector.load %arg3[%c0_3, %c0_4] : memref<1x16xf32, #tpu.memory_space<vmem>>, vector<1x16xf32>
    %4 = vector.broadcast %3 : vector<1x16xf32> to vector<128x16xf32>
    %5 = arith.addf %2, %4 : vector<128x16xf32>
    %c0_5 = arith.constant 0 : index
    %c0_6 = arith.constant 0 : index
    %6 = vector.load %arg4[%c0_5, %c0_6] : memref<1x16xf32, #tpu.memory_space<vmem>>, vector<1x16xf32>
    %c0_7 = arith.constant 0 : index
    %c0_8 = arith.constant 0 : index
    %7 = vector.load %arg5[%c0_7, %c0_8] : memref<1x16xf32, #tpu.memory_space<vmem>>, vector<1x16xf32>
    %cst_9 = arith.constant dense<0.000000e+00> : vector<16xf32>
    %8 = vector.multi_reduction <add>, %5, %cst_9 [0] : vector<128x16xf32> to vector<16xf32>
    %9 = vector.shape_cast %8 : vector<16xf32> to vector<1x16xf32>
    %cst_10 = arith.constant 1.280000e+02 : f32
    %10 = vector.broadcast %cst_10 : f32 to vector<1x16xf32>
    %11 = arith.divf %9, %10 : vector<1x16xf32>
    %12 = vector.broadcast %11 : vector<1x16xf32> to vector<128x16xf32>
    %13 = arith.subf %5, %12 : vector<128x16xf32>
    %14 = arith.mulf %13, %13 : vector<128x16xf32>
    %cst_11 = arith.constant dense<0.000000e+00> : vector<16xf32>
    %15 = vector.multi_reduction <add>, %14, %cst_11 [0] : vector<128x16xf32> to vector<16xf32>
    %16 = vector.shape_cast %15 : vector<16xf32> to vector<1x16xf32>
    %cst_12 = arith.constant 1.280000e+02 : f32
    %17 = vector.broadcast %cst_12 : f32 to vector<1x16xf32>
    %18 = arith.divf %16, %17 : vector<1x16xf32>
    %cst_13 = arith.constant 9.99999974E-6 : f32
    %19 = vector.broadcast %cst_13 : f32 to vector<1x16xf32>
    %20 = arith.addf %18, %19 : vector<1x16xf32>
    %21 = math.rsqrt %20 : vector<1x16xf32>
    %22 = arith.mulf %6, %21 : vector<1x16xf32>
    %23 = vector.broadcast %22 : vector<1x16xf32> to vector<128x16xf32>
    %24 = arith.mulf %13, %23 : vector<128x16xf32>
    %25 = vector.broadcast %7 : vector<1x16xf32> to vector<128x16xf32>
    %26 = arith.addf %24, %25 : vector<128x16xf32>
    %cst_14 = arith.constant 0.000000e+00 : f32
    %27 = vector.broadcast %cst_14 : f32 to vector<128x16xf32>
    %28 = arith.maximumf %26, %27 : vector<128x16xf32>
    %c0_15 = arith.constant 0 : index
    %c0_16 = arith.constant 0 : index
    %29 = vector.load %arg6[%c0_15, %c0_16] : memref<64x128xf32, #tpu.memory_space<vmem>>, vector<64x128xf32>
    %c127_i32 = arith.constant 127 : i32
    %30 = tpu.dynamic_rotate %28 by %c127_i32 dim 0 : vector<128x16xf32>, i32 -> vector<128x16xf32>
    %31 = arith.maximumf %28, %30 : vector<128x16xf32>
    %cst_17 = arith.constant dense<0.000000e+00> : vector<64x16xf32>
    %32 = tpu.matmul %29, %31, %cst_17 {dimension_numbers = #tpu.dot_dimension_numbers<[1], [0], [0], [1], [0, 0, 1, 1], [], []>} : vector<64x128xf32>, vector<128x16xf32>, vector<64x16xf32> -> vector<64x16xf32>
    %c0_18 = arith.constant 0 : index
    %c0_19 = arith.constant 0 : index
    %33 = vector.load %arg7[%c0_18, %c0_19] : memref<48x32xbf16, #tpu.memory_space<vmem>>, vector<48x32xbf16>
    %c0_20 = arith.constant 0 : index
    %c0_21 = arith.constant 0 : index
    %34 = vector.load %arg8[%c0_20, %c0_21] : memref<1x32xf32, #tpu.memory_space<vmem>>, vector<1x32xf32>
    %35 = tpu.iota {dimensions = array<i32: 0>} : vector<64x16xi32>
    %c31_i32 = arith.constant 31 : i32
    %36 = vector.broadcast %c31_i32 : i32 to vector<64x16xi32>
    %37 = arith.andi %35, %36 : vector<64x16xi32>
    %c0_i32 = arith.constant 0 : i32
    %38 = vector.broadcast %c0_i32 : i32 to vector<64x16xi32>
    %39 = arith.cmpi ne, %37, %38 : vector<64x16xi32>
    %c1_i32 = arith.constant 1 : i32
    %40 = tpu.dynamic_rotate %32 by %c1_i32 dim 0 : vector<64x16xf32>, i32 -> vector<64x16xf32>
    %cst_22 = arith.constant 0.000000e+00 : f32
    %41 = vector.broadcast %cst_22 : f32 to vector<64x16xf32>
    %42 = arith.select %39, %40, %41 : vector<64x16xi1>, vector<64x16xf32>
    %c31_i32_23 = arith.constant 31 : i32
    %43 = vector.broadcast %c31_i32_23 : i32 to vector<64x16xi32>
    %44 = arith.cmpi ne, %37, %43 : vector<64x16xi32>
    %c63_i32 = arith.constant 63 : i32
    %45 = tpu.dynamic_rotate %32 by %c63_i32 dim 0 : vector<64x16xf32>, i32 -> vector<64x16xf32>
    %cst_24 = arith.constant 0.000000e+00 : f32
    %46 = vector.broadcast %cst_24 : f32 to vector<64x16xf32>
    %47 = arith.select %44, %45, %46 : vector<64x16xi1>, vector<64x16xf32>
    %48 = tpu.concatenate %42, %32, %47 in 1 : vector<64x16xf32>, vector<64x16xf32>, vector<64x16xf32> -> vector<64x48xf32>
    %49 = arith.truncf %48 : vector<64x48xf32> to vector<64x48xbf16>
    %cst_25 = arith.constant dense<0.000000e+00> : vector<64x32xf32>
    %50 = tpu.matmul %49, %33, %cst_25 {dimension_numbers = #tpu.dot_dimension_numbers<[1], [0], [0], [1], [0, 0, 1, 1], [], []>} : vector<64x48xbf16>, vector<48x32xbf16>, vector<64x32xf32> -> vector<64x32xf32>
    %51 = vector.broadcast %34 : vector<1x32xf32> to vector<64x32xf32>
    %52 = arith.addf %50, %51 : vector<64x32xf32>
    %c0_26 = arith.constant 0 : index
    %c0_27 = arith.constant 0 : index
    %53 = vector.load %arg9[%c0_26, %c0_27] : memref<1x32xf32, #tpu.memory_space<vmem>>, vector<1x32xf32>
    %c0_28 = arith.constant 0 : index
    %c0_29 = arith.constant 0 : index
    %54 = vector.load %arg10[%c0_28, %c0_29] : memref<1x32xf32, #tpu.memory_space<vmem>>, vector<1x32xf32>
    %cst_30 = arith.constant dense<0.000000e+00> : vector<32xf32>
    %55 = vector.multi_reduction <add>, %52, %cst_30 [0] : vector<64x32xf32> to vector<32xf32>
    %56 = vector.shape_cast %55 : vector<32xf32> to vector<1x32xf32>
    %cst_31 = arith.constant 6.400000e+01 : f32
    %57 = vector.broadcast %cst_31 : f32 to vector<1x32xf32>
    %58 = arith.divf %56, %57 : vector<1x32xf32>
    %59 = vector.broadcast %58 : vector<1x32xf32> to vector<64x32xf32>
    %60 = arith.subf %52, %59 : vector<64x32xf32>
    %61 = arith.mulf %60, %60 : vector<64x32xf32>
    %cst_32 = arith.constant dense<0.000000e+00> : vector<32xf32>
    %62 = vector.multi_reduction <add>, %61, %cst_32 [0] : vector<64x32xf32> to vector<32xf32>
    %63 = vector.shape_cast %62 : vector<32xf32> to vector<1x32xf32>
    %cst_33 = arith.constant 6.400000e+01 : f32
    %64 = vector.broadcast %cst_33 : f32 to vector<1x32xf32>
    %65 = arith.divf %63, %64 : vector<1x32xf32>
    %cst_34 = arith.constant 9.99999974E-6 : f32
    %66 = vector.broadcast %cst_34 : f32 to vector<1x32xf32>
    %67 = arith.addf %65, %66 : vector<1x32xf32>
    %68 = math.rsqrt %67 : vector<1x32xf32>
    %69 = arith.mulf %53, %68 : vector<1x32xf32>
    %70 = vector.broadcast %69 : vector<1x32xf32> to vector<64x32xf32>
    %71 = arith.mulf %60, %70 : vector<64x32xf32>
    %72 = vector.broadcast %54 : vector<1x32xf32> to vector<64x32xf32>
    %73 = arith.addf %71, %72 : vector<64x32xf32>
    %cst_35 = arith.constant 0.000000e+00 : f32
    %74 = vector.broadcast %cst_35 : f32 to vector<64x32xf32>
    %75 = arith.maximumf %73, %74 : vector<64x32xf32>
    %c0_36 = arith.constant 0 : index
    %c0_37 = arith.constant 0 : index
    %76 = vector.load %arg11[%c0_36, %c0_37] : memref<32x64xf32, #tpu.memory_space<vmem>>, vector<32x64xf32>
    %c63_i32_38 = arith.constant 63 : i32
    %77 = tpu.dynamic_rotate %75 by %c63_i32_38 dim 0 : vector<64x32xf32>, i32 -> vector<64x32xf32>
    %78 = arith.maximumf %75, %77 : vector<64x32xf32>
    %cst_39 = arith.constant dense<0.000000e+00> : vector<32x32xf32>
    %79 = tpu.matmul %76, %78, %cst_39 {dimension_numbers = #tpu.dot_dimension_numbers<[1], [0], [0], [1], [0, 0, 1, 1], [], []>} : vector<32x64xf32>, vector<64x32xf32>, vector<32x32xf32> -> vector<32x32xf32>
    %c0_40 = arith.constant 0 : index
    %c0_41 = arith.constant 0 : index
    %80 = vector.load %arg12[%c0_40, %c0_41] : memref<96x64xbf16, #tpu.memory_space<vmem>>, vector<96x64xbf16>
    %c0_42 = arith.constant 0 : index
    %c0_43 = arith.constant 0 : index
    %81 = vector.load %arg13[%c0_42, %c0_43] : memref<1x64xf32, #tpu.memory_space<vmem>>, vector<1x64xf32>
    %82 = tpu.iota {dimensions = array<i32: 0>} : vector<32x32xi32>
    %c15_i32 = arith.constant 15 : i32
    %83 = vector.broadcast %c15_i32 : i32 to vector<32x32xi32>
    %84 = arith.andi %82, %83 : vector<32x32xi32>
    %c0_i32_44 = arith.constant 0 : i32
    %85 = vector.broadcast %c0_i32_44 : i32 to vector<32x32xi32>
    %86 = arith.cmpi ne, %84, %85 : vector<32x32xi32>
    %c1_i32_45 = arith.constant 1 : i32
    %87 = tpu.dynamic_rotate %79 by %c1_i32_45 dim 0 : vector<32x32xf32>, i32 -> vector<32x32xf32>
    %cst_46 = arith.constant 0.000000e+00 : f32
    %88 = vector.broadcast %cst_46 : f32 to vector<32x32xf32>
    %89 = arith.select %86, %87, %88 : vector<32x32xi1>, vector<32x32xf32>
    %c15_i32_47 = arith.constant 15 : i32
    %90 = vector.broadcast %c15_i32_47 : i32 to vector<32x32xi32>
    %91 = arith.cmpi ne, %84, %90 : vector<32x32xi32>
    %c31_i32_48 = arith.constant 31 : i32
    %92 = tpu.dynamic_rotate %79 by %c31_i32_48 dim 0 : vector<32x32xf32>, i32 -> vector<32x32xf32>
    %cst_49 = arith.constant 0.000000e+00 : f32
    %93 = vector.broadcast %cst_49 : f32 to vector<32x32xf32>
    %94 = arith.select %91, %92, %93 : vector<32x32xi1>, vector<32x32xf32>
    %95 = tpu.concatenate %89, %79, %94 in 1 : vector<32x32xf32>, vector<32x32xf32>, vector<32x32xf32> -> vector<32x96xf32>
    %96 = arith.truncf %95 : vector<32x96xf32> to vector<32x96xbf16>
    %cst_50 = arith.constant dense<0.000000e+00> : vector<32x64xf32>
    %97 = tpu.matmul %96, %80, %cst_50 {dimension_numbers = #tpu.dot_dimension_numbers<[1], [0], [0], [1], [0, 0, 1, 1], [], []>} : vector<32x96xbf16>, vector<96x64xbf16>, vector<32x64xf32> -> vector<32x64xf32>
    %98 = vector.broadcast %81 : vector<1x64xf32> to vector<32x64xf32>
    %99 = arith.addf %97, %98 : vector<32x64xf32>
    %c0_51 = arith.constant 0 : index
    %c0_52 = arith.constant 0 : index
    %100 = vector.load %arg14[%c0_51, %c0_52] : memref<1x64xf32, #tpu.memory_space<vmem>>, vector<1x64xf32>
    %c0_53 = arith.constant 0 : index
    %c0_54 = arith.constant 0 : index
    %101 = vector.load %arg15[%c0_53, %c0_54] : memref<1x64xf32, #tpu.memory_space<vmem>>, vector<1x64xf32>
    %cst_55 = arith.constant dense<0.000000e+00> : vector<64xf32>
    %102 = vector.multi_reduction <add>, %99, %cst_55 [0] : vector<32x64xf32> to vector<64xf32>
    %103 = vector.shape_cast %102 : vector<64xf32> to vector<1x64xf32>
    %cst_56 = arith.constant 3.200000e+01 : f32
    %104 = vector.broadcast %cst_56 : f32 to vector<1x64xf32>
    %105 = arith.divf %103, %104 : vector<1x64xf32>
    %106 = vector.broadcast %105 : vector<1x64xf32> to vector<32x64xf32>
    %107 = arith.subf %99, %106 : vector<32x64xf32>
    %108 = arith.mulf %107, %107 : vector<32x64xf32>
    %cst_57 = arith.constant dense<0.000000e+00> : vector<64xf32>
    %109 = vector.multi_reduction <add>, %108, %cst_57 [0] : vector<32x64xf32> to vector<64xf32>
    %110 = vector.shape_cast %109 : vector<64xf32> to vector<1x64xf32>
    %cst_58 = arith.constant 3.200000e+01 : f32
    %111 = vector.broadcast %cst_58 : f32 to vector<1x64xf32>
    %112 = arith.divf %110, %111 : vector<1x64xf32>
    %cst_59 = arith.constant 9.99999974E-6 : f32
    %113 = vector.broadcast %cst_59 : f32 to vector<1x64xf32>
    %114 = arith.addf %112, %113 : vector<1x64xf32>
    %115 = math.rsqrt %114 : vector<1x64xf32>
    %116 = arith.mulf %100, %115 : vector<1x64xf32>
    %117 = vector.broadcast %116 : vector<1x64xf32> to vector<32x64xf32>
    %118 = arith.mulf %107, %117 : vector<32x64xf32>
    %119 = vector.broadcast %101 : vector<1x64xf32> to vector<32x64xf32>
    %120 = arith.addf %118, %119 : vector<32x64xf32>
    %cst_60 = arith.constant 0.000000e+00 : f32
    %121 = vector.broadcast %cst_60 : f32 to vector<32x64xf32>
    %122 = arith.maximumf %120, %121 : vector<32x64xf32>
    %c0_61 = arith.constant 0 : index
    %c0_62 = arith.constant 0 : index
    %123 = vector.load %arg16[%c0_61, %c0_62] : memref<16x32xf32, #tpu.memory_space<vmem>>, vector<16x32xf32>
    %c31_i32_63 = arith.constant 31 : i32
    %124 = tpu.dynamic_rotate %122 by %c31_i32_63 dim 0 : vector<32x64xf32>, i32 -> vector<32x64xf32>
    %125 = arith.maximumf %122, %124 : vector<32x64xf32>
    %cst_64 = arith.constant dense<0.000000e+00> : vector<16x64xf32>
    %126 = tpu.matmul %123, %125, %cst_64 {dimension_numbers = #tpu.dot_dimension_numbers<[1], [0], [0], [1], [0, 0, 1, 1], [], []>} : vector<16x32xf32>, vector<32x64xf32>, vector<16x64xf32> -> vector<16x64xf32>
    %c0_65 = arith.constant 0 : index
    %c0_66 = arith.constant 0 : index
    %127 = vector.load %arg17[%c0_65, %c0_66] : memref<192x64xbf16, #tpu.memory_space<vmem>>, vector<192x64xbf16>
    %c0_67 = arith.constant 0 : index
    %c0_68 = arith.constant 0 : index
    %128 = vector.load %arg18[%c0_67, %c0_68] : memref<1x64xf32, #tpu.memory_space<vmem>>, vector<1x64xf32>
    %129 = tpu.iota {dimensions = array<i32: 0>} : vector<16x64xi32>
    %c7_i32 = arith.constant 7 : i32
    %130 = vector.broadcast %c7_i32 : i32 to vector<16x64xi32>
    %131 = arith.andi %129, %130 : vector<16x64xi32>
    %c0_i32_69 = arith.constant 0 : i32
    %132 = vector.broadcast %c0_i32_69 : i32 to vector<16x64xi32>
    %133 = arith.cmpi ne, %131, %132 : vector<16x64xi32>
    %c1_i32_70 = arith.constant 1 : i32
    %134 = tpu.dynamic_rotate %126 by %c1_i32_70 dim 0 : vector<16x64xf32>, i32 -> vector<16x64xf32>
    %cst_71 = arith.constant 0.000000e+00 : f32
    %135 = vector.broadcast %cst_71 : f32 to vector<16x64xf32>
    %136 = arith.select %133, %134, %135 : vector<16x64xi1>, vector<16x64xf32>
    %c7_i32_72 = arith.constant 7 : i32
    %137 = vector.broadcast %c7_i32_72 : i32 to vector<16x64xi32>
    %138 = arith.cmpi ne, %131, %137 : vector<16x64xi32>
    %c15_i32_73 = arith.constant 15 : i32
    %139 = tpu.dynamic_rotate %126 by %c15_i32_73 dim 0 : vector<16x64xf32>, i32 -> vector<16x64xf32>
    %cst_74 = arith.constant 0.000000e+00 : f32
    %140 = vector.broadcast %cst_74 : f32 to vector<16x64xf32>
    %141 = arith.select %138, %139, %140 : vector<16x64xi1>, vector<16x64xf32>
    %142 = tpu.concatenate %136, %126, %141 in 1 : vector<16x64xf32>, vector<16x64xf32>, vector<16x64xf32> -> vector<16x192xf32>
    %143 = arith.truncf %142 : vector<16x192xf32> to vector<16x192xbf16>
    %cst_75 = arith.constant dense<0.000000e+00> : vector<16x64xf32>
    %144 = tpu.matmul %143, %127, %cst_75 {dimension_numbers = #tpu.dot_dimension_numbers<[1], [0], [0], [1], [0, 0, 1, 1], [], []>} : vector<16x192xbf16>, vector<192x64xbf16>, vector<16x64xf32> -> vector<16x64xf32>
    %145 = vector.broadcast %128 : vector<1x64xf32> to vector<16x64xf32>
    %146 = arith.addf %144, %145 : vector<16x64xf32>
    %c0_76 = arith.constant 0 : index
    %c0_77 = arith.constant 0 : index
    %147 = vector.load %arg19[%c0_76, %c0_77] : memref<1x64xf32, #tpu.memory_space<vmem>>, vector<1x64xf32>
    %c0_78 = arith.constant 0 : index
    %c0_79 = arith.constant 0 : index
    %148 = vector.load %arg20[%c0_78, %c0_79] : memref<1x64xf32, #tpu.memory_space<vmem>>, vector<1x64xf32>
    %cst_80 = arith.constant dense<0.000000e+00> : vector<64xf32>
    %149 = vector.multi_reduction <add>, %146, %cst_80 [0] : vector<16x64xf32> to vector<64xf32>
    %150 = vector.shape_cast %149 : vector<64xf32> to vector<1x64xf32>
    %cst_81 = arith.constant 1.600000e+01 : f32
    %151 = vector.broadcast %cst_81 : f32 to vector<1x64xf32>
    %152 = arith.divf %150, %151 : vector<1x64xf32>
    %153 = vector.broadcast %152 : vector<1x64xf32> to vector<16x64xf32>
    %154 = arith.subf %146, %153 : vector<16x64xf32>
    %155 = arith.mulf %154, %154 : vector<16x64xf32>
    %cst_82 = arith.constant dense<0.000000e+00> : vector<64xf32>
    %156 = vector.multi_reduction <add>, %155, %cst_82 [0] : vector<16x64xf32> to vector<64xf32>
    %157 = vector.shape_cast %156 : vector<64xf32> to vector<1x64xf32>
    %cst_83 = arith.constant 1.600000e+01 : f32
    %158 = vector.broadcast %cst_83 : f32 to vector<1x64xf32>
    %159 = arith.divf %157, %158 : vector<1x64xf32>
    %cst_84 = arith.constant 9.99999974E-6 : f32
    %160 = vector.broadcast %cst_84 : f32 to vector<1x64xf32>
    %161 = arith.addf %159, %160 : vector<1x64xf32>
    %162 = math.rsqrt %161 : vector<1x64xf32>
    %163 = arith.mulf %147, %162 : vector<1x64xf32>
    %164 = vector.broadcast %163 : vector<1x64xf32> to vector<16x64xf32>
    %165 = arith.mulf %154, %164 : vector<16x64xf32>
    %166 = vector.broadcast %148 : vector<1x64xf32> to vector<16x64xf32>
    %167 = arith.addf %165, %166 : vector<16x64xf32>
    %cst_85 = arith.constant 0.000000e+00 : f32
    %168 = vector.broadcast %cst_85 : f32 to vector<16x64xf32>
    %169 = arith.maximumf %167, %168 : vector<16x64xf32>
    %c0_86 = arith.constant 0 : index
    %c0_87 = arith.constant 0 : index
    %170 = vector.load %arg21[%c0_86, %c0_87] : memref<8x16xf32, #tpu.memory_space<vmem>>, vector<8x16xf32>
    %c15_i32_88 = arith.constant 15 : i32
    %171 = tpu.dynamic_rotate %169 by %c15_i32_88 dim 0 : vector<16x64xf32>, i32 -> vector<16x64xf32>
    %172 = arith.maximumf %169, %171 : vector<16x64xf32>
    %cst_89 = arith.constant dense<0.000000e+00> : vector<8x64xf32>
    %173 = tpu.matmul %170, %172, %cst_89 {dimension_numbers = #tpu.dot_dimension_numbers<[1], [0], [0], [1], [0, 0, 1, 1], [], []>} : vector<8x16xf32>, vector<16x64xf32>, vector<8x64xf32> -> vector<8x64xf32>
    %c0_90 = arith.constant 0 : index
    %c0_91 = arith.constant 0 : index
    %174 = vector.load %arg22[%c0_90, %c0_91] : memref<192x64xbf16, #tpu.memory_space<vmem>>, vector<192x64xbf16>
    %c0_92 = arith.constant 0 : index
    %c0_93 = arith.constant 0 : index
    %175 = vector.load %arg23[%c0_92, %c0_93] : memref<1x64xf32, #tpu.memory_space<vmem>>, vector<1x64xf32>
    %176 = tpu.iota {dimensions = array<i32: 0>} : vector<8x64xi32>
    %c3_i32 = arith.constant 3 : i32
    %177 = vector.broadcast %c3_i32 : i32 to vector<8x64xi32>
    %178 = arith.andi %176, %177 : vector<8x64xi32>
    %c0_i32_94 = arith.constant 0 : i32
    %179 = vector.broadcast %c0_i32_94 : i32 to vector<8x64xi32>
    %180 = arith.cmpi ne, %178, %179 : vector<8x64xi32>
    %c1_i32_95 = arith.constant 1 : i32
    %181 = tpu.dynamic_rotate %173 by %c1_i32_95 dim 0 : vector<8x64xf32>, i32 -> vector<8x64xf32>
    %cst_96 = arith.constant 0.000000e+00 : f32
    %182 = vector.broadcast %cst_96 : f32 to vector<8x64xf32>
    %183 = arith.select %180, %181, %182 : vector<8x64xi1>, vector<8x64xf32>
    %c3_i32_97 = arith.constant 3 : i32
    %184 = vector.broadcast %c3_i32_97 : i32 to vector<8x64xi32>
    %185 = arith.cmpi ne, %178, %184 : vector<8x64xi32>
    %c7_i32_98 = arith.constant 7 : i32
    %186 = tpu.dynamic_rotate %173 by %c7_i32_98 dim 0 : vector<8x64xf32>, i32 -> vector<8x64xf32>
    %cst_99 = arith.constant 0.000000e+00 : f32
    %187 = vector.broadcast %cst_99 : f32 to vector<8x64xf32>
    %188 = arith.select %185, %186, %187 : vector<8x64xi1>, vector<8x64xf32>
    %189 = tpu.concatenate %183, %173, %188 in 1 : vector<8x64xf32>, vector<8x64xf32>, vector<8x64xf32> -> vector<8x192xf32>
    %190 = arith.truncf %189 : vector<8x192xf32> to vector<8x192xbf16>
    %cst_100 = arith.constant dense<0.000000e+00> : vector<8x64xf32>
    %191 = tpu.matmul %190, %174, %cst_100 {dimension_numbers = #tpu.dot_dimension_numbers<[1], [0], [0], [1], [0, 0, 1, 1], [], []>} : vector<8x192xbf16>, vector<192x64xbf16>, vector<8x64xf32> -> vector<8x64xf32>
    %192 = vector.broadcast %175 : vector<1x64xf32> to vector<8x64xf32>
    %193 = arith.addf %191, %192 : vector<8x64xf32>
    %c0_101 = arith.constant 0 : index
    %c0_102 = arith.constant 0 : index
    %194 = vector.load %arg24[%c0_101, %c0_102] : memref<1x64xf32, #tpu.memory_space<vmem>>, vector<1x64xf32>
    %c0_103 = arith.constant 0 : index
    %c0_104 = arith.constant 0 : index
    %195 = vector.load %arg25[%c0_103, %c0_104] : memref<1x64xf32, #tpu.memory_space<vmem>>, vector<1x64xf32>
    %cst_105 = arith.constant dense<0.000000e+00> : vector<64xf32>
    %196 = vector.multi_reduction <add>, %193, %cst_105 [0] : vector<8x64xf32> to vector<64xf32>
    %197 = vector.shape_cast %196 : vector<64xf32> to vector<1x64xf32>
    %cst_106 = arith.constant 8.000000e+00 : f32
    %198 = vector.broadcast %cst_106 : f32 to vector<1x64xf32>
    %199 = arith.divf %197, %198 : vector<1x64xf32>
    %200 = vector.broadcast %199 : vector<1x64xf32> to vector<8x64xf32>
    %201 = arith.subf %193, %200 : vector<8x64xf32>
    %202 = arith.mulf %201, %201 : vector<8x64xf32>
    %cst_107 = arith.constant dense<0.000000e+00> : vector<64xf32>
    %203 = vector.multi_reduction <add>, %202, %cst_107 [0] : vector<8x64xf32> to vector<64xf32>
    %204 = vector.shape_cast %203 : vector<64xf32> to vector<1x64xf32>
    %cst_108 = arith.constant 8.000000e+00 : f32
    %205 = vector.broadcast %cst_108 : f32 to vector<1x64xf32>
    %206 = arith.divf %204, %205 : vector<1x64xf32>
    %cst_109 = arith.constant 9.99999974E-6 : f32
    %207 = vector.broadcast %cst_109 : f32 to vector<1x64xf32>
    %208 = arith.addf %206, %207 : vector<1x64xf32>
    %209 = math.rsqrt %208 : vector<1x64xf32>
    %210 = arith.mulf %194, %209 : vector<1x64xf32>
    %211 = vector.broadcast %210 : vector<1x64xf32> to vector<8x64xf32>
    %212 = arith.mulf %201, %211 : vector<8x64xf32>
    %213 = vector.broadcast %195 : vector<1x64xf32> to vector<8x64xf32>
    %214 = arith.addf %212, %213 : vector<8x64xf32>
    %cst_110 = arith.constant 0.000000e+00 : f32
    %215 = vector.broadcast %cst_110 : f32 to vector<8x64xf32>
    %216 = arith.maximumf %214, %215 : vector<8x64xf32>
    %c0_111 = arith.constant 0 : index
    %c0_112 = arith.constant 0 : index
    %217 = vector.load %arg26[%c0_111, %c0_112] : memref<4x8xf32, #tpu.memory_space<vmem>>, vector<4x8xf32>
    %c7_i32_113 = arith.constant 7 : i32
    %218 = tpu.dynamic_rotate %216 by %c7_i32_113 dim 0 : vector<8x64xf32>, i32 -> vector<8x64xf32>
    %219 = arith.maximumf %216, %218 : vector<8x64xf32>
    %cst_114 = arith.constant dense<0.000000e+00> : vector<4x64xf32>
    %220 = tpu.matmul %217, %219, %cst_114 {dimension_numbers = #tpu.dot_dimension_numbers<[1], [0], [0], [1], [0, 0, 1, 1], [], []>} : vector<4x8xf32>, vector<8x64xf32>, vector<4x64xf32> -> vector<4x64xf32>
    %c0_115 = arith.constant 0 : index
    %c0_116 = arith.constant 0 : index
    %221 = vector.load %arg27[%c0_115, %c0_116] : memref<2x4xf32, #tpu.memory_space<vmem>>, vector<2x4xf32>
    %cst_117 = arith.constant dense<0.000000e+00> : vector<2x64xf32>
    %222 = tpu.matmul %221, %220, %cst_117 {dimension_numbers = #tpu.dot_dimension_numbers<[1], [0], [0], [1], [0, 0, 1, 1], [], []>} : vector<2x4xf32>, vector<4x64xf32>, vector<2x64xf32> -> vector<2x64xf32>
    %c0_118 = arith.constant 0 : index
    %c0_119 = arith.constant 0 : index
    %223 = vector.load %arg28[%c0_118, %c0_119] : memref<2x4xf32, #tpu.memory_space<vmem>>, vector<2x4xf32>
    %cst_120 = arith.constant dense<0.000000e+00> : vector<2x64xf32>
    %224 = tpu.matmul %223, %220, %cst_120 {dimension_numbers = #tpu.dot_dimension_numbers<[1], [0], [0], [1], [0, 0, 1, 1], [], []>} : vector<2x4xf32>, vector<4x64xf32>, vector<2x64xf32> -> vector<2x64xf32>
    %225 = tpu.concatenate %222, %224 in 1 : vector<2x64xf32>, vector<2x64xf32> -> vector<2x128xf32>
    %226 = arith.truncf %225 : vector<2x128xf32> to vector<2x128xbf16>
    %c0_121 = arith.constant 0 : index
    %c0_122 = arith.constant 0 : index
    %227 = vector.load %arg29[%c0_121, %c0_122] : memref<128x100xbf16, #tpu.memory_space<vmem>>, vector<128x100xbf16>
    %cst_123 = arith.constant dense<0.000000e+00> : vector<2x100xf32>
    %228 = tpu.matmul %226, %227, %cst_123 {dimension_numbers = #tpu.dot_dimension_numbers<[1], [0], [0], [1], [0, 0, 1, 1], [], []>} : vector<2x128xbf16>, vector<128x100xbf16>, vector<2x100xf32> -> vector<2x100xf32>
    %c0_124 = arith.constant 0 : index
    %c0_125 = arith.constant 0 : index
    %229 = vector.load %arg30[%c0_124, %c0_125] : memref<1x100xf32, #tpu.memory_space<vmem>>, vector<1x100xf32>
    %230 = vector.broadcast %229 : vector<1x100xf32> to vector<2x100xf32>
    %231 = arith.addf %228, %230 : vector<2x100xf32>
    %cst_126 = arith.constant 0.000000e+00 : f32
    %232 = vector.broadcast %cst_126 : f32 to vector<2x100xf32>
    %233 = arith.maximumf %231, %232 : vector<2x100xf32>
    %234 = arith.truncf %233 : vector<2x100xf32> to vector<2x100xbf16>
    %c0_127 = arith.constant 0 : index
    %c0_128 = arith.constant 0 : index
    %235 = vector.load %arg31[%c0_127, %c0_128] : memref<100x10xbf16, #tpu.memory_space<vmem>>, vector<100x10xbf16>
    %cst_129 = arith.constant dense<0.000000e+00> : vector<2x10xf32>
    %236 = tpu.matmul %234, %235, %cst_129 {dimension_numbers = #tpu.dot_dimension_numbers<[1], [0], [0], [1], [0, 0, 1, 1], [], []>} : vector<2x100xbf16>, vector<100x10xbf16>, vector<2x10xf32> -> vector<2x10xf32>
    %c0_130 = arith.constant 0 : index
    %c0_131 = arith.constant 0 : index
    %237 = vector.load %arg32[%c0_130, %c0_131] : memref<1x10xf32, #tpu.memory_space<vmem>>, vector<1x10xf32>
    %238 = vector.broadcast %237 : vector<1x10xf32> to vector<2x10xf32>
    %239 = arith.addf %236, %238 : vector<2x10xf32>
    %cst_132 = arith.constant dense<0xFF800000> : vector<2xf32>
    %240 = vector.multi_reduction <maximumf>, %239, %cst_132 [1] : vector<2x10xf32> to vector<2xf32>
    %241 = vector.shape_cast %240 : vector<2xf32> to vector<2x1xf32>
    %242 = vector.broadcast %241 : vector<2x1xf32> to vector<2x10xf32>
    %243 = arith.subf %239, %242 : vector<2x10xf32>
    %244 = math.exp %243 : vector<2x10xf32>
    %cst_133 = arith.constant dense<0.000000e+00> : vector<2xf32>
    %245 = vector.multi_reduction <add>, %244, %cst_133 [1] : vector<2x10xf32> to vector<2xf32>
    %246 = vector.shape_cast %245 : vector<2xf32> to vector<2x1xf32>
    %247 = vector.broadcast %246 : vector<2x1xf32> to vector<2x10xf32>
    %248 = arith.divf %244, %247 : vector<2x10xf32>
    %c0_134 = arith.constant 0 : index
    %c0_135 = arith.constant 0 : index
    %249 = vector.load %arg33[%c0_134, %c0_135] : memref<2x10xf32, #tpu.memory_space<vmem>>, vector<2x10xf32>
    tpu.vector_store %arg33[%c0_134, %c0_135], %248 {strides = array<i32>} : memref<2x10xf32, #tpu.memory_space<vmem>>, vector<2x10xf32>,
    return
  }
  func.func @transform_0(%arg0: i32) -> (i32, i32) {
    %c0_i32 = arith.constant 0 : i32
    %c0_i32_0 = arith.constant 0 : i32
    %c0_i32_1 = arith.constant 0 : i32
    return %c0_i32, %c0_i32_0 : i32, i32
  }
  func.func @transform_1(%arg0: i32) -> (i32, i32) {
    %c0_i32 = arith.constant 0 : i32
    %c0_i32_0 = arith.constant 0 : i32
    %c0_i32_1 = arith.constant 0 : i32
    return %c0_i32, %c0_i32_0 : i32, i32
  }
  func.func @transform_2(%arg0: i32) -> (i32, i32) {
    %c0_i32 = arith.constant 0 : i32
    %c0_i32_0 = arith.constant 0 : i32
    %c0_i32_1 = arith.constant 0 : i32
    return %c0_i32, %c0_i32_0 : i32, i32
  }
  func.func @transform_3(%arg0: i32) -> (i32, i32) {
    %c0_i32 = arith.constant 0 : i32
    %c0_i32_0 = arith.constant 0 : i32
    %c0_i32_1 = arith.constant 0 : i32
    return %c0_i32, %c0_i32_0 : i32, i32
  }
  func.func @transform_4(%arg0: i32) -> (i32, i32) {
    %c0_i32 = arith.constant 0 : i32
    %c0_i32_0 = arith.constant 0 : i32
    %c0_i32_1 = arith.constant 0 : i32
    return %c0_i32, %c0_i32_0 : i32, i32
  }
  func.func @transform_5(%arg0: i32) -> (i32, i32) {
    %c0_i32 = arith.constant 0 : i32
    %c0_i32_0 = arith.constant 0 : i32
    %c0_i32_1 = arith.constant 0 : i32
    return %c0_i32, %c0_i32_0 : i32, i32
  }
  func.func @transform_6(%arg0: i32) -> (i32, i32) {
    %c0_i32 = arith.constant 0 : i32
    %c0_i32_0 = arith.constant 0 : i32
    %c0_i32_1 = arith.constant 0 : i32
    return %c0_i32, %c0_i32_0 : i32, i32
  }
  func.func @transform_7(%arg0: i32) -> (i32, i32) {
    %c0_i32 = arith.constant 0 : i32
    %c0_i32_0 = arith.constant 0 : i32
    %c0_i32_1 = arith.constant 0 : i32
    return %c0_i32, %c0_i32_0 : i32, i32
  }
  func.func @transform_8(%arg0: i32) -> (i32, i32) {
    %c0_i32 = arith.constant 0 : i32
    %c0_i32_0 = arith.constant 0 : i32
    %c0_i32_1 = arith.constant 0 : i32
    return %c0_i32, %c0_i32_0 : i32, i32
  }
  func.func @transform_9(%arg0: i32) -> (i32, i32) {
    %c0_i32 = arith.constant 0 : i32
    %c0_i32_0 = arith.constant 0 : i32
    %c0_i32_1 = arith.constant 0 : i32
    return %c0_i32, %c0_i32_0 : i32, i32
  }
  func.func @transform_10(%arg0: i32) -> (i32, i32) {
    %c0_i32 = arith.constant 0 : i32
    %c0_i32_0 = arith.constant 0 : i32
    %c0_i32_1 = arith.constant 0 : i32
    return %c0_i32, %c0_i32_0 : i32, i32
  }
  func.func @transform_11(%arg0: i32) -> (i32, i32) {
    %c0_i32 = arith.constant 0 : i32
    %c0_i32_0 = arith.constant 0 : i32
    %c0_i32_1 = arith.constant 0 : i32
    return %c0_i32, %c0_i32_0 : i32, i32
  }
  func.func @transform_12(%arg0: i32) -> (i32, i32) {
    %c0_i32 = arith.constant 0 : i32
    %c0_i32_0 = arith.constant 0 : i32
    %c0_i32_1 = arith.constant 0 : i32
    return %c0_i32, %c0_i32_0 : i32, i32
  }
  func.func @transform_13(%arg0: i32) -> (i32, i32) {
    %c0_i32 = arith.constant 0 : i32
    %c0_i32_0 = arith.constant 0 : i32
    %c0_i32_1 = arith.constant 0 : i32
    return %c0_i32, %c0_i32_0 : i32, i32
  }
  func.func @transform_14(%arg0: i32) -> (i32, i32) {
    %c0_i32 = arith.constant 0 : i32
    %c0_i32_0 = arith.constant 0 : i32
    %c0_i32_1 = arith.constant 0 : i32
    return %c0_i32, %c0_i32_0 : i32, i32
  }
  func.func @transform_15(%arg0: i32) -> (i32, i32) {
    %c0_i32 = arith.constant 0 : i32
    %c0_i32_0 = arith.constant 0 : i32
    %c0_i32_1 = arith.constant 0 : i32
    return %c0_i32, %c0_i32_0 : i32, i32
  }
  func.func @transform_16(%arg0: i32) -> (i32, i32) {
    %c0_i32 = arith.constant 0 : i32
    %c0_i32_0 = arith.constant 0 : i32
    %c0_i32_1 = arith.constant 0 : i32
    return %c0_i32, %c0_i32_0 : i32, i32
  }
  func.func @transform_17(%arg0: i32) -> (i32, i32) {
    %c0_i32 = arith.constant 0 : i32
    %c0_i32_0 = arith.constant 0 : i32
    %c0_i32_1 = arith.constant 0 : i32
    return %c0_i32, %c0_i32_0 : i32, i32
  }
  func.func @transform_18(%arg0: i32) -> (i32, i32) {
    %c0_i32 = arith.constant 0 : i32
    %c0_i32_0 = arith.constant 0 : i32
    %c0_i32_1 = arith.constant 0 : i32
    return %c0_i32, %c0_i32_0 : i32, i32
  }
  func.func @transform_19(%arg0: i32) -> (i32, i32) {
    %c0_i32 = arith.constant 0 : i32
    %c0_i32_0 = arith.constant 0 : i32
    %c0_i32_1 = arith.constant 0 : i32
    return %c0_i32, %c0_i32_0 : i32, i32
  }
  func.func @transform_20(%arg0: i32) -> (i32, i32) {
    %c0_i32 = arith.constant 0 : i32
    %c0_i32_0 = arith.constant 0 : i32
    %c0_i32_1 = arith.constant 0 : i32
    return %c0_i32, %c0_i32_0 : i32, i32
  }
  func.func @transform_21(%arg0: i32) -> (i32, i32) {
    %c0_i32 = arith.constant 0 : i32
    %c0_i32_0 = arith.constant 0 : i32
    %c0_i32_1 = arith.constant 0 : i32
    return %c0_i32, %c0_i32_0 : i32, i32
  }
  func.func @transform_22(%arg0: i32) -> (i32, i32) {
    %c0_i32 = arith.constant 0 : i32
    %c0_i32_0 = arith.constant 0 : i32
    %c0_i32_1 = arith.constant 0 : i32
    return %c0_i32, %c0_i32_0 : i32, i32
  }
  func.func @transform_23(%arg0: i32) -> (i32, i32) {
    %c0_i32 = arith.constant 0 : i32
    %c0_i32_0 = arith.constant 0 : i32
    %c0_i32_1 = arith.constant 0 : i32
    return %c0_i32, %c0_i32_0 : i32, i32
  }
  func.func @transform_24(%arg0: i32) -> (i32, i32) {
    %c0_i32 = arith.constant 0 : i32
    %c0_i32_0 = arith.constant 0 : i32
    %c0_i32_1 = arith.constant 0 : i32
    return %c0_i32, %c0_i32_0 : i32, i32
  }
  func.func @transform_25(%arg0: i32) -> (i32, i32) {
    %c0_i32 = arith.constant 0 : i32
    %c0_i32_0 = arith.constant 0 : i32
    %c0_i32_1 = arith.constant 0 : i32
    return %c0_i32, %c0_i32_0 : i32, i32
  }
  func.func @transform_26(%arg0: i32) -> (i32, i32) {
    %c0_i32 = arith.constant 0 : i32
    %c0_i32_0 = arith.constant 0 : i32
    %c0_i32_1 = arith.constant 0 : i32
    return %c0_i32, %c0_i32_0 : i32, i32
  }
  func.func @transform_27(%arg0: i32) -> (i32, i32) {
    %c0_i32 = arith.constant 0 : i32
    %c0_i32_0 = arith.constant 0 : i32
    %c0_i32_1 = arith.constant 0 : i32
    return %c0_i32, %c0_i32_0 : i32, i32
  }
  func.func @transform_28(%arg0: i32) -> (i32, i32) {
    %c0_i32 = arith.constant 0 : i32
    %c0_i32_0 = arith.constant 0 : i32
    %c0_i32_1 = arith.constant 0 : i32
    return %c0_i32, %c0_i32_0 : i32, i32
  }
  func.func @transform_29(%arg0: i32) -> (i32, i32) {
    %c0_i32 = arith.constant 0 : i32
    %c0_i32_0 = arith.constant 0 : i32
    %c0_i32_1 = arith.constant 0 : i32
    return %c0_i32, %c0_i32_0 : i32, i32
  }
  func.func @transform_30(%arg0: i32) -> (i32, i32) {
    %c0_i32 = arith.constant 0 : i32
    %c0_i32_0 = arith.constant 0 : i32
    %c0_i32_1 = arith.constant 0 : i32
    return %c0_i32, %c0_i32_0 : i32, i32
  }
  func.func @transform_31(%arg0: i32) -> (i32, i32) {
    %c0_i32 = arith.constant 0 : i32
    %c0_i32_0 = arith.constant 0 : i32
    %c0_i32_1 = arith.constant 0 : i32
    return %c0_i32, %c0_i32_0 : i32, i32
  }
  func.func @transform_32(%arg0: i32) -> (i32, i32) {
    %c0_i32 = arith.constant 0 : i32
    %c0_i32_0 = arith.constant 0 : i32
    %c0_i32_1 = arith.constant 0 : i32
    return %c0_i32, %c0_i32_0 : i32, i32
  }
}

</mosaic_0001>

<bundles_post_ra>
// kernel: wdcnn_forward.1
= control target key start
LH: loop header
LB: loop body
LE: loop exit
PB: predicated region body
PF: predicated region fallthrough
CT: control target
= control target key end

     0   :  { %s3211_s6 = smov 1   ;;  %s3212_s10 = smov 2   ;;  %s4060_s0 = inlined_call_operand.smem [shape: u32[33], index: -1, kind: input, shape index: {}] }
   0x1   :  { %s3259_s5 = sld [smem:[%s4060_s0]]   ;;  %s3213_s14 = smov 3  }
   0x2   :  { %s3264_s9 = sld [smem:[%s4060_s0 + %s3211_s6]]   ;;  %s3214_s18 = smov 4  }
   0x3   :  { %s3269_s13 = sld [smem:[%s4060_s0 + %s3212_s10]]   ;;  %s3215_s22 = smov 5  }
   0x4   :  { %s3274_s17 = sld [smem:[%s4060_s0 + %s3213_s14]]   ;;  %s3216_s26 = smov 6  }
   0x5   :  { %s3279_s21 = sld [smem:[%s4060_s0 + %s3214_s18]]   ;;  %s3217_s30 = smov 7  }
   0x6   :  { %s3284_s25 = sld [smem:[%s4060_s0 + %s3215_s22]]   ;;  %s3218_s4 = smov 8  }
   0x7   :  { %s3289_s29 = sld [smem:[%s4060_s0 + %s3216_s26]]   ;;  %s3219_s10 = smov 9  }
   0x8   :  { %s3294_s3 = sld [smem:[%s4060_s0 + %s3217_s30]]   ;;  %s3220_s15 = smov 10  }
   0x9   :  { %s3299_s8 = sld [smem:[%s4060_s0 + %s3218_s4]]   ;;  %s3221_s20 = smov 11  }
   0xa   :  { %s3304_s14 = sld [smem:[%s4060_s0 + %s3219_s10]]   ;;  %s3222_s26 = smov 12  }
   0xb   :  { %s3309_s19 = sld [smem:[%s4060_s0 + %s3220_s15]]   ;;  %s3223_s1 = smov 13  }
   0xc   :  { %s3314_s24 = sld [smem:[%s4060_s0 + %s3221_s20]]   ;;  %s3224_s7 = smov 14  }
   0xd   :  { %s3319_s30 = sld [smem:[%s4060_s0 + %s3222_s26]]   ;;  %s3225_s15 = smov 15  }
   0xe   :  { %s3324_s6 = sld [smem:[%s4060_s0 + %s3223_s1]]   ;;  %s3226_s22 = smov 16  }
   0xf   :  { %s3329_s12 = sld [smem:[%s4060_s0 + %s3224_s7]]   ;;  %s3227_s28 = smov 17  }
  0x10   :  { %s3334_s20 = sld [smem:[%s4060_s0 + %s3225_s15]]   ;;  %s3228_s7 = smov 18  }
  0x11   :  { %s3339_s27 = sld [smem:[%s4060_s0 + %s3226_s22]]   ;;  %s3229_s15 = smov 19  }
  0x12   :  { %s3344_s4 = sld [smem:[%s4060_s0 + %s3227_s28]]   ;;  %s3230_s22 = smov 20  }
  0x13   :  { %s3231_s28 = smov 21  }
  0x14   :  { %4064 = sst [smem:[#allocation5_spill]] %s3324_s6 }
  0x15   :  { %4065 = sst [smem:[#allocation6_spill]] %s3329_s12 }
  0x16   :  { %s3349_s12 = sld [smem:[%s4060_s0 + %s3228_s7]]   ;;  %s3232_s7 = smov 22  }
  0x17   :  { %4066 = sst [smem:[#allocation7_spill]] %s3339_s27 }
  0x18   :  { %4067 = sst [smem:[#allocation8_spill]] %s3344_s4 }
  0x19   :  { %s3354_s6 = sld [smem:[%s4060_s0 + %s3229_s15]]   ;;  %s3233_s15 = smov 23  }
  0x1a   :  { %s3359_s27 = sld [smem:[%s4060_s0 + %s3230_s22]]   ;;  %s3234_s22 = smov 24  }
  0x1b   :  { %s3364_s4 = sld [smem:[%s4060_s0 + %s3231_s28]]   ;;  %s3235_s28 = smov 25  }
  0x1c   :  { %4068 = sst [smem:[#allocation9_spill]] %s3349_s12 }
  0x1d   :  { %s3369_s12 = sld [smem:[%s4060_s0 + %s3232_s7]]   ;;  %s3236_s7 = smov 26  }
  0x1f   :  { %4069 = sst [smem:[#allocation10_spill]] %s3354_s6 }
  0x20   :  { %4070 = sst [smem:[#allocation11_spill]] %s3359_s27 }
  0x21   :  { %4071 = sst [smem:[#allocation12_spill]] %s3364_s4 }
  0x22   :  { %s3374_s6 = sld [smem:[%s4060_s0 + %s3233_s15]]   ;;  %s3237_s15 = smov 27  }
  0x23   :  { %4072 = sst [smem:[#allocation13_spill]] %s3369_s12 }
  0x24   :  { %s3379_s27 = sld [smem:[%s4060_s0 + %s3234_s22]]   ;;  %s3238_s22 = smov 28  }
  0x25   :  { %s3384_s4 = sld [smem:[%s4060_s0 + %s3235_s28]]   ;;  %s3239_s28 = smov 29  }
  0x26   :  { %s3389_s12 = sld [smem:[%s4060_s0 + %s3236_s7]]   ;;  %s3240_s7 = smov 30  }
  0x28   :  { %4073 = sst [smem:[#allocation14_spill]] %s3374_s6 }
  0x29   :  { %s3394_s6 = sld [smem:[%s4060_s0 + %s3237_s15]]   ;;  %s3241_s15 = smov 31  }
  0x2a   :  { %4074 = sst [smem:[#allocation15_spill]] %s3379_s27 }
  0x2b   :  { %4075 = sst [smem:[#allocation16_spill]] %s3384_s4 }
  0x2c   :  { %4076 = sst [smem:[#allocation17_spill]] %s3389_s12 }
  0x2d   :  { %s3399_s27 = sld [smem:[%s4060_s0 + %s3238_s22]]   ;;  %s3242_s22 = smov 32  }
  0x2e   :  { %s3404_s4 = sld [smem:[%s4060_s0 + %s3239_s28]]  }
  0x2f   :  { %4077 = sst [smem:[#allocation18_spill]] %s3394_s6 }
  0x30   :  { %s3409_s12 = sld [smem:[%s4060_s0 + %s3240_s7]]  }
  0x31   :  { %s3414_s6 = sld [smem:[%s4060_s0 + %s3241_s15]]  }
  0x33   :  { %4078 = sst [smem:[#allocation19_spill]] %s3399_s27 }
  0x34   :  { %s3419_s27 = sld [smem:[%s4060_s0 + %s3242_s22]]  }
  0x35   :  { %v3113_v0 = vld [vmem:[%s3264_s9] sm:$0xff]   ;;  %v3114_v1 = vld [vmem:[%s3264_s9 + $0x8] sm:$0xff]   ;;  %v3115_v2 = vld [vmem:[%s3264_s9 + $0x10] sm:$0xff]   ;;  %vm231_vm0 = vcmask 523264  }
  0x36   :  { %2758 = vmatprep.subr.bf16.mxu0 %v3113_v0  ;;  %v3117_v3 = vld [vmem:[%s3259_s5] sm:$0xff]   ;;  %v3116_v4 = vld [vmem:[%s3264_s9 + $0x18] sm:$0xff]   ;;  %v3118_v5 = vld [vmem:[%s3259_s5 + $0x8] sm:$0xff]  }
  0x37   :  { %2759 = vmatpush3.bf16.msra.mxu0 %v3113_v0  ;;  %2766 = vmatprep.mubr.msk.bf16.mxu0 %vm231_vm0, %v3117_v3  ;;  %v3119_v6 = vld [vmem:[%s3259_s5 + $0x10] sm:$0xff]   ;;  %v3120_v7 = vld [vmem:[%s3259_s5 + $0x18] sm:$0xff]   ;;  %v3121_v8 = vld [vmem:[%s3259_s5 + $0x20] sm:$0xff]  }
  0x38   :  { %2760 = vmatprep.subr.bf16.mxu0 %v3114_v1  ;;  %v3122_v9 = vld [vmem:[%s3259_s5 + $0x28] sm:$0xff]   ;;  %v3123_v10 = vld [vmem:[%s3259_s5 + $0x30] sm:$0xff]   ;;  %v3124_v11 = vld [vmem:[%s3259_s5 + $0x38] sm:$0xff]  }
  0x3b   :  { %2761 = vmatpush3.bf16.msra.mxu0 %v3114_v1 }
  0x3c   :  { %2762 = vmatprep.subr.bf16.mxu0 %v3115_v2 }
  0x3f   :  { %2763 = vmatpush3.bf16.msra.mxu0 %v3115_v2 }
  0x40   :  { %2764 = vmatprep.subr.bf16.mxu0 %v3116_v4 }
  0x43   :  { %2765 = vmatpush3.bf16.msra.mxu0 %v3116_v4 }
  0x46   :  { %2767 = vmatmul.mubr.msk.bf16.vlgmr.msra.gmra.mrb[0].mxu0 %vm231_vm0, %v3118_v5 }
  0x47   :  { %2770 = vmatprep.mubr.msk.bf16.mxu0 %vm231_vm0, %v3119_v6 }
  0x4e   :  { %2771 = vmatmul.mubr.msk.bf16.gmra.mrb[4].mxu0 %vm231_vm0, %v3120_v7 }
  0x4f   :  { %2774 = vmatprep.mubr.msk.bf16.mxu0 %vm231_vm0, %v3121_v8 }
  0x56   :  { %2775 = vmatmul.mubr.msk.bf16.gmra.mrb[8].mxu0 %vm231_vm0, %v3122_v9 }
  0x57   :  { %2778 = vmatprep.mubr.msk.bf16.mxu0 %vm231_vm0, %v3123_v10 }
  0x5e   :  { %2779 = vmatmul.mubr.msk.bf16.gmra.mrb[12].mxu0 %vm231_vm0, %v3124_v11 }
  0x5f   :  { %70 = vsyncpa [#allocation3], 0  ;;  %v2562_v12 = vld [vmem:[%s3269_s13] ss:$0 sm:$0xff]  ;;  %vm355_vm1 = vcmask 130048   ;;  %s3243_s0 = smov 16  }
  0x60   :  { %s3244_s5 = smov 32   ;;  %vm851_vm7 = vcmask 261120   ;;  %vm888_vm8 = vcmask 392192   ;;  %s3245_s9 = smov 64   ;;  %vm1326_vm14 = vcmask 785408  }
  0x61   :  { %s4087_s13 = sld [smem:[#allocation5_spill]]  ;;  %s4105_s28 = sld [smem:[#allocation17_spill]] }
  0x62   :  { %s4106_s1 = sld [smem:[#allocation18_spill]]  ;;  %s4107_s2 = sld [smem:[#allocation19_spill]] }
 0x119   :  { %v2768_v13 = vpop.f32.mrb[0].mxu0 }
 0x11a   :  { %v290_v14 = vpop.f32.mrb[1].mxu0  ;;  %v3444_v18 = vadd.f32 %v2768_v13, %v2562_v12  ;;  %v528_v13 = vld [vmem:[%s3284_s25] sm:$0xff] }
 0x11b   :  { %v3442_v15 = vadd.f32 %v2562_v12, %v290_v14  ;;  %v2769_v16 = vpop.f32.mrb[2].mxu0  ;;  %2814 = vmatprep.mubr.f32.mxu1 %v528_v13 }
 0x11c   :  { %v293_v17 = vpop.f32.mrb[3].mxu0  ;;  %v3450_v21 = vadd.f32 %v2769_v16, %v2562_v12  ;;  %v359_v24 = vsel %vm355_vm1, %v3444_v18, 0.0 }
 0x11d   :  { %v3446_v19 = vadd.f32 %v2562_v12, %v293_v17  ;;  %v356_v20 = vsel %vm355_vm1, %v3442_v15, 0.0 }
 0x11e   :  { %v361_v28 = vsel %vm355_vm1, %v3450_v21, 0.0 }
 0x11f   :  { %v357_v22 = vsel %vm355_vm1, %v3446_v19, 0.0 }
 0x120   :  { %v358_v23 = vadd.f32 %v357_v22, %v356_v20 }
 0x121   :  { %v2772_v25 = vpop.f32.mrb[4].mxu0 }
 0x122   :  { %v360_v26 = vadd.f32 %v359_v24, %v358_v23  ;;  %v306_v27 = vpop.f32.mrb[5].mxu0  ;;  %v315_v33 = vadd.f32 %v2772_v25, %v2562_v12 }
 0x123   :  { %v307_v29 = vadd.f32 %v2562_v12, %v306_v27  ;;  %v2773_v30 = vpop.f32.mrb[6].mxu0 }
 0x124   :  { %v362_v31 = vadd.f32 %v361_v28, %v360_v26  ;;  %v309_v32 = vpop.f32.mrb[7].mxu0  ;;  %v318_v37 = vadd.f32 %v2773_v30, %v2562_v12  ;;  %v367_v40 = vsel %vm355_vm1, %v315_v33, 0.0 }
 0x125   :  { %v363_v34 = vsel %vm355_vm1, %v307_v29, 0.0  ;;  %v310_v35 = vadd.f32 %v2562_v12, %v309_v32 }
 0x126   :  { %v364_v36 = vadd.f32 %v363_v34, %v362_v31  ;;  %v369_v44 = vsel %vm355_vm1, %v318_v37, 0.0 }
 0x127   :  { %v365_v38 = vsel %vm355_vm1, %v310_v35, 0.0 }
 0x128   :  { %v366_v39 = vadd.f32 %v365_v38, %v364_v36 }
 0x129   :  { %v2776_v41 = vpop.f32.mrb[8].mxu0 }
 0x12a   :  { %v368_v42 = vadd.f32 %v367_v40, %v366_v39  ;;  %v322_v43 = vpop.f32.mrb[9].mxu0  ;;  %v331_v49 = vadd.f32 %v2776_v41, %v2562_v12 }
 0x12b   :  { %v323_v45 = vadd.f32 %v2562_v12, %v322_v43  ;;  %v2777_v46 = vpop.f32.mrb[10].mxu0 }
 0x12c   :  { %v370_v47 = vadd.f32 %v369_v44, %v368_v42  ;;  %v325_v48 = vpop.f32.mrb[11].mxu0  ;;  %v334_v53 = vadd.f32 %v2777_v46, %v2562_v12  ;;  %v375_v56 = vsel %vm355_vm1, %v331_v49, 0.0 }
 0x12d   :  { %v371_v50 = vsel %vm355_vm1, %v323_v45, 0.0  ;;  %v326_v51 = vadd.f32 %v2562_v12, %v325_v48 }
 0x12e   :  { %v372_v52 = vadd.f32 %v371_v50, %v370_v47  ;;  %v377_v60 = vsel %vm355_vm1, %v334_v53, 0.0 }
 0x12f   :  { %v373_v54 = vsel %vm355_vm1, %v326_v51, 0.0 }
 0x130   :  { %v374_v55 = vadd.f32 %v373_v54, %v372_v52 }
 0x131   :  { %v2780_v57 = vpop.f32.mrb[12].mxu0 }
 0x132   :  { %v376_v58 = vadd.f32 %v375_v56, %v374_v55  ;;  %v338_v59 = vpop.f32.mrb[13].mxu0  ;;  %v347_v1 = vadd.f32 %v2780_v57, %v2562_v12 }
 0x133   :  { %v339_v61 = vadd.f32 %v2562_v12, %v338_v59  ;;  %v2781_v62 = vpop.f32.mrb[14].mxu0 }
 0x134   :  { %v378_v63 = vadd.f32 %v377_v60, %v376_v58  ;;  %v341_v0 = vpop.f32.mrb[15].mxu0  ;;  %v350_v5 = vadd.f32 %v2781_v62, %v2562_v12  ;;  %v383_v8 = vsel %vm355_vm1, %v347_v1, 0.0 }
 0x135   :  { %v379_v2 = vsel %vm355_vm1, %v339_v61, 0.0  ;;  %v342_v3 = vadd.f32 %v2562_v12, %v341_v0 }
 0x136   :  { %v380_v4 = vadd.f32 %v379_v2, %v378_v63  ;;  %v385_v10 = vsel %vm355_vm1, %v350_v5, 0.0 }
 0x137   :  { %v381_v6 = vsel %vm355_vm1, %v342_v3, 0.0 }
 0x138   :  { %v382_v7 = vadd.f32 %v381_v6, %v380_v4 }
 0x13a   :  { %v384_v9 = vadd.f32 %v383_v8, %v382_v7 }
 0x13c   :  { %v386_v11 = vadd.f32 %v385_v10, %v384_v9 }
 0x13e   :  { %v387_v14 = vrot.slane %v386_v11, 4 }
 0x140   :  { %v388_v16 = vadd.f32 %v387_v14, %v386_v11 }
 0x142   :  { %v389_v17 = vrot.slane %v388_v16, 2 }
 0x144   :  { %v390_v20 = vadd.f32 %v389_v17, %v388_v16 }
 0x146   :  { %v391_v22 = vrot.slane %v390_v20, 1 }
 0x148   :  { %v392_v23 = vadd.f32 %v391_v22, %v390_v20 }
 0x14a   :  { %v394_v24 = vmul.f32 0.0078125, %v392_v23 }
 0x14c   :  { %v3472_v12 = vsub.f32 %v3442_v15, %v394_v24  ;;  %v3475_v25 = vsub.f32 %v3446_v19, %v394_v24  ;;  %v3478_v26 = vsub.f32 %v3444_v18, %v394_v24  ;;  %v3481_v27 = vsub.f32 %v3450_v21, %v394_v24 }
 0x14d   :  { %v3483_v28 = vsub.f32 %v307_v29, %v394_v24  ;;  %v3485_v30 = vsub.f32 %v310_v35, %v394_v24  ;;  %v3487_v31 = vsub.f32 %v315_v33, %v394_v24  ;;  %v3489_v32 = vsub.f32 %v318_v37, %v394_v24 }
 0x14e   :  { %v3491_v34 = vsub.f32 %v323_v45, %v394_v24  ;;  %v3493_v15 = vsub.f32 %v326_v51, %v394_v24  ;;  %v3495_v19 = vsub.f32 %v331_v49, %v394_v24  ;;  %v3497_v36 = vsub.f32 %v334_v53, %v394_v24 }
 0x14f   :  { %v3499_v18 = vsub.f32 %v339_v61, %v394_v24  ;;  %v3501_v21 = vsub.f32 %v342_v3, %v394_v24  ;;  %v3503_v29 = vsub.f32 %v347_v1, %v394_v24  ;;  %v3505_v35 = vsub.f32 %v350_v5, %v394_v24 }
 0x150   :  { %v411_v33 = vmul.f32 %v3472_v12, %v3472_v12  ;;  %v412_v37 = vmul.f32 %v3475_v25, %v3475_v25  ;;  %v413_v38 = vmul.f32 %v3478_v26, %v3478_v26  ;;  %v414_v39 = vmul.f32 %v3481_v27, %v3481_v27 }
 0x151   :  { %v415_v43 = vmul.f32 %v3483_v28, %v3483_v28  ;;  %v416_v46 = vmul.f32 %v3485_v30, %v3485_v30  ;;  %v417_v49 = vmul.f32 %v3487_v31, %v3487_v31  ;;  %v418_v52 = vmul.f32 %v3489_v32, %v3489_v32 }
 0x152   :  { %v427_v40 = vsel %vm355_vm1, %v411_v33, 0.0  ;;  %v428_v41 = vsel %vm355_vm1, %v412_v37, 0.0  ;;  %v430_v44 = vsel %vm355_vm1, %v413_v38, 0.0  ;;  %v432_v47 = vsel %vm355_vm1, %v414_v39, 0.0 }
 0x153   :  { %v429_v42 = vadd.f32 %v428_v41, %v427_v40  ;;  %v434_v50 = vsel %vm355_vm1, %v415_v43, 0.0  ;;  %v436_v53 = vsel %vm355_vm1, %v416_v46, 0.0  ;;  %v419_v55 = vmul.f32 %v3491_v34, %v3491_v34 }
 0x154   :  { %v438_v56 = vsel %vm355_vm1, %v417_v49, 0.0  ;;  %v420_v58 = vmul.f32 %v3493_v15, %v3493_v15  ;;  %v440_v59 = vsel %vm355_vm1, %v418_v52, 0.0  ;;  %v421_v61 = vmul.f32 %v3495_v19, %v3495_v19 }
 0x155   :  { %v431_v45 = vadd.f32 %v430_v44, %v429_v42  ;;  %v442_v62 = vsel %vm355_vm1, %v419_v55, 0.0  ;;  %v422_v0 = vmul.f32 %v3497_v36, %v3497_v36  ;;  %v423_v3 = vmul.f32 %v3499_v18, %v3499_v18 }
 0x156   :  { %v444_v1 = vsel %vm355_vm1, %v420_v58, 0.0  ;;  %v446_v4 = vsel %vm355_vm1, %v421_v61, 0.0  ;;  %v424_v6 = vmul.f32 %v3501_v21, %v3501_v21  ;;  %v425_v9 = vmul.f32 %v3503_v29, %v3503_v29 }
 0x157   :  { %v433_v48 = vadd.f32 %v432_v47, %v431_v45  ;;  %v448_v7 = vsel %vm355_vm1, %v422_v0, 0.0  ;;  %v450_v10 = vsel %vm355_vm1, %v423_v3, 0.0  ;;  %v426_v13 = vmul.f32 %v3505_v35, %v3505_v35  ;;  %v353_v45 = vld [vmem:[%s3274_s17] sm:$0x1]  ;;  %s4088_s17 = sld [smem:[#allocation6_spill]] }
 0x158   :  { %v452_v14 = vsel %vm355_vm1, %v424_v6, 0.0  ;;  %v454_v17 = vsel %vm355_vm1, %v425_v9, 0.0  ;;  %v469_v43 = vlaneseq }
 0x159   :  { %v435_v51 = vadd.f32 %v434_v50, %v433_v48  ;;  %v456_v22 = vsel %vm355_vm1, %v426_v13, 0.0  ;;  %v3565_v50 = vld [vmem:[%s3279_s21] ss:$0 sm:$0xff]  ;;  %s4089_s21 = sld [smem:[#allocation7_spill]] }
 0x15a   :  { %v3555_v44 = vshrl.u32 %v469_v43, 7 }
 0x15b   :  { %v437_v54 = vadd.f32 %v436_v53, %v435_v51 }
 0x15c   :  { %v3559_v46 = vsub.s32 0, %v3555_v44  ;;  %vm554_vm2 = vcmp.lt.s32.totalorder %v3555_v44, 7  ;;  %vm730_vm3 = vcmp.lt.s32.totalorder %v3555_v44, 1 }
 0x15d   :  { %v439_v57 = vadd.f32 %v438_v56, %v437_v54 }
 0x15f   :  { %v441_v60 = vadd.f32 %v440_v59, %v439_v57 }
 0x161   :  { %v443_v63 = vadd.f32 %v442_v62, %v441_v60 }
 0x163   :  { %v445_v2 = vadd.f32 %v444_v1, %v443_v63 }
 0x165   :  { %v447_v5 = vadd.f32 %v446_v4, %v445_v2 }
 0x167   :  { %v449_v8 = vadd.f32 %v448_v7, %v447_v5 }
 0x169   :  { %v451_v11 = vadd.f32 %v450_v10, %v449_v8 }
 0x16b   :  { %v453_v16 = vadd.f32 %v452_v14, %v451_v11 }
 0x16d   :  { %v455_v20 = vadd.f32 %v454_v17, %v453_v16 }
 0x16f   :  { %v457_v23 = vadd.f32 %v456_v22, %v455_v20 }
 0x171   :  { %v458_v24 = vrot.slane %v457_v23, 4 }
 0x173   :  { %v459_v33 = vadd.f32 %v458_v24, %v457_v23 }
 0x175   :  { %v460_v37 = vrot.slane %v459_v33, 2 }
 0x177   :  { %v461_v38 = vadd.f32 %v460_v37, %v459_v33 }
 0x179   :  { %v462_v39 = vrot.slane %v461_v38, 1 }
 0x17b   :  { %v463_v40 = vadd.f32 %v462_v39, %v461_v38 }
 0x17d   :  { %v464_v41 = vmul.f32 0.0078125, %v463_v40 }
 0x17f   :  { %v465_v42 = vadd.f32 1e-05, %v464_v41 }
 0x181   :  { %3173 = vrsqrt.f32 %v465_v42 }
 0x18b   :  { %v3174_v47 = vpop.eup %3173 }
 0x18c   :  { %v467_v48 = vmul.f32 %v3174_v47, %v353_v45 }
 0x18e   :  { %v3562_v49 = vrot.slane %v467_v48, %v3559_v46 }
 0x190   :  { %v487_v51 = vmul.f32 %v3562_v49, %v3501_v21  ;;  %v474_v52 = vmul.f32 %v3562_v49, %v3472_v12  ;;  %v475_v53 = vmul.f32 %v3562_v49, %v3475_v25  ;;  %v476_v54 = vmul.f32 %v3562_v49, %v3478_v26 }
 0x191   :  { %v477_v55 = vmul.f32 %v3562_v49, %v3481_v27  ;;  %v478_v56 = vmul.f32 %v3562_v49, %v3483_v28  ;;  %v479_v57 = vmul.f32 %v3562_v49, %v3485_v30  ;;  %v480_v21 = vmul.f32 %v3562_v49, %v3487_v31 }
 0x192   :  { %v3585_v12 = vadd.f32 %v3565_v50, %v487_v51  ;;  %v496_v25 = vadd.f32 %v3565_v50, %v474_v52  ;;  %v497_v58 = vadd.f32 %v3565_v50, %v475_v53  ;;  %v498_v26 = vadd.f32 %v3565_v50, %v476_v54 }
 0x193   :  { %v499_v27 = vadd.f32 %v3565_v50, %v477_v55  ;;  %v500_v59 = vadd.f32 %v3565_v50, %v478_v56  ;;  %v501_v28 = vadd.f32 %v3565_v50, %v479_v57  ;;  %v3594_v30 = vadd.f32 %v3565_v50, %v480_v21 }
 0x194   :  { %v525_v31 = vmax.f32 %v3585_v12, 0.0  ;;  %v512_v60 = vmax.f32 %v496_v25, 0.0  ;;  %v513_v61 = vmax.f32 %v497_v58, 0.0  ;;  %v514_v62 = vmax.f32 %v498_v26, 0.0  ;;  %v529_v12 = vld [vmem:[%s3284_s25 + $0x8] sm:$0xff] }
 0x195   :  { %v515_v63 = vmax.f32 %v499_v27, 0.0  ;;  %v516_v0 = vmax.f32 %v500_v59, 0.0  ;;  %v517_v1 = vmax.f32 %v501_v28, 0.0  ;;  %v518_v2 = vmax.f32 %v3594_v30, 0.0 }
 0x196   :  { %v3600_v3 = vrot.slane %v525_v31, 1  ;;  %v3602_v4 = vrot.slane %v512_v60, 1  ;;  %v537_v5 = vrot.slane %v513_v61, 1  ;;  %v538_v6 = vrot.slane %v514_v62, 1 }
 0x197   :  { %v539_v7 = vrot.slane %v515_v63, 1  ;;  %v540_v8 = vrot.slane %v516_v0, 1  ;;  %v541_v9 = vrot.slane %v517_v1, 1  ;;  %v542_v10 = vrot.slane %v518_v2, 1 }
 0x198   :  { %v568_v11 = vsel %vm554_vm2, %v537_v5, %v538_v6  ;;  %v569_v13 = vsel %vm554_vm2, %v3602_v4, %v537_v5  ;;  %v481_v14 = vmul.f32 %v3562_v49, %v3489_v32  ;;  %v482_v16 = vmul.f32 %v3562_v49, %v3491_v34 }
 0x199   :  { %v571_v17 = vmax.f32 %v512_v60, %v569_v13  ;;  %v572_v20 = vmax.f32 %v513_v61, %v568_v11  ;;  %v566_v22 = vsel %vm554_vm2, %v539_v7, %v540_v8  ;;  %v567_v23 = vsel %vm554_vm2, %v538_v6, %v539_v7 }
 0x19a   :  { %v573_v24 = vmax.f32 %v514_v62, %v567_v23  ;;  %v574_v33 = vmax.f32 %v515_v63, %v566_v22  ;;  %v564_v37 = vsel %vm554_vm2, %v541_v9, %v542_v10  ;;  %v565_v38 = vsel %vm554_vm2, %v540_v8, %v541_v9 }
 0x19b   :  { %v2949_v32 = vpack.c.bf16 %v572_v20, %v571_v17  ;;  %v575_v39 = vmax.f32 %v516_v0, %v565_v38  ;;  %v576_v40 = vmax.f32 %v517_v1, %v564_v37  ;;  %v503_v34 = vadd.f32 %v3565_v50, %v481_v14 }
 0x19c   :  { %v2953_v41 = vpack.c.bf16 %v574_v33, %v573_v24  ;;  %v504_v42 = vadd.f32 %v3565_v50, %v482_v16  ;;  %v483_v43 = vmul.f32 %v3562_v49, %v3493_v15  ;;  %v484_v45 = vmul.f32 %v3562_v49, %v3495_v19 }
 0x19d   :  { %2950 = vmatprep.subr.bf16.mxu1 %v2949_v32  ;;  %v2957_v47 = vpack.c.bf16 %v576_v40, %v575_v39  ;;  %v519_v48 = vmax.f32 %v503_v34, 0.0  ;;  %v485_v51 = vmul.f32 %v3562_v49, %v3497_v36  ;;  %v486_v52 = vmul.f32 %v3562_v49, %v3499_v18  ;;  %v532_v39 = vld [vmem:[%s3284_s25 + $0x20] sm:$0xff]  ;;  %v533_v40 = vld [vmem:[%s3284_s25 + $0x28] sm:$0xff]  ;;  %v534_v34 = vld [vmem:[%s3284_s25 + $0x30] sm:$0xff] }
 0x19e   :  { %2952 = vmatpush3.bf16.msra.mxu1 %v2949_v32  ;;  %v520_v53 = vmax.f32 %v504_v42, 0.0  ;;  %v505_v54 = vadd.f32 %v3565_v50, %v483_v43  ;;  %v506_v55 = vadd.f32 %v3565_v50, %v484_v45  ;;  %v488_v15 = vmul.f32 %v3562_v49, %v3503_v29  ;;  %v3125_v42 = vld [vmem:[%s3289_s29] sm:$0xff]   ;;  %v3126_v43 = vld [vmem:[%s3289_s29 + $0x8] sm:$0xff]  }
 0x19f   :  { %2954 = vmatprep.subr.bf16.mxu1 %v2953_v41  ;;  %v543_v19 = vrot.slane %v519_v48, 1  ;;  %v507_v56 = vadd.f32 %v3565_v50, %v485_v51  ;;  %v508_v57 = vadd.f32 %v3565_v50, %v486_v52  ;;  %v489_v36 = vmul.f32 %v3562_v49, %v3505_v35  ;;  %2826 = vmatprep.subr.bf16.mxu0 %v3125_v42 }
 0x1a0   :  { %v544_v21 = vrot.slane %v520_v53, 1  ;;  %v521_v18 = vmax.f32 %v505_v54, 0.0  ;;  %v522_v25 = vmax.f32 %v506_v55, 0.0  ;;  %v510_v58 = vadd.f32 %v3565_v50, %v488_v15  ;;  %2827 = vmatpush3.bf16.msra.mxu0 %v3125_v42 }
 0x1a1   :  { %v563_v26 = vsel %vm554_vm2, %v542_v10, %v543_v19  ;;  %v523_v27 = vmax.f32 %v507_v56, 0.0  ;;  %v524_v59 = vmax.f32 %v508_v57, 0.0  ;;  %v511_v29 = vadd.f32 %v3565_v50, %v489_v36  ;;  %2828 = vmatprep.subr.bf16.mxu0 %v3126_v43 }
 0x1a2   :  { %2956 = vmatpush3.bf16.msra.mxu1 %v2953_v41  ;;  %v562_v28 = vsel %vm554_vm2, %v543_v19, %v544_v21  ;;  %v577_v30 = vmax.f32 %v518_v2, %v563_v26  ;;  %v545_v60 = vrot.slane %v521_v18, 1  ;;  %v546_v61 = vrot.slane %v522_v25, 1  ;;  %v535_v41 = vld [vmem:[%s3284_s25 + $0x38] sm:$0xff] }
 0x1a3   :  { %2958 = vmatprep.subr.bf16.mxu1 %v2957_v47  ;;  %v578_v35 = vmax.f32 %v519_v48, %v562_v28  ;;  %v547_v49 = vrot.slane %v523_v27, 1  ;;  %v548_v62 = vrot.slane %v524_v59, 1  ;;  %v526_v63 = vmax.f32 %v510_v58, 0.0 }
 0x1a4   :  { %v560_v0 = vsel %vm554_vm2, %v545_v60, %v546_v61  ;;  %v561_v1 = vsel %vm554_vm2, %v544_v21, %v545_v60  ;;  %v527_v5 = vmax.f32 %v511_v29, 0.0  ;;  %2829 = vmatpush3.bf16.msra.mxu0 %v3126_v43  ;;  %v3677_v55 = vadd.s32 24, %v3555_v44 }
 0x1a5   :  { %v2961_v50 = vpack.c.bf16 %v578_v35, %v577_v30  ;;  %v579_v6 = vmax.f32 %v520_v53, %v561_v1  ;;  %v580_v7 = vmax.f32 %v521_v18, %v560_v0  ;;  %v558_v2 = vsel %vm554_vm2, %v547_v49, %v548_v62 }
 0x1a6   :  { %2960 = vmatpush3.bf16.msra.mxu1 %v2957_v47  ;;  %v559_v8 = vsel %vm554_vm2, %v546_v61, %v547_v49  ;;  %v582_v9 = vmax.f32 %v523_v27, %v558_v2  ;;  %v550_v10 = vrot.slane %v526_v63, 1  ;;  %v557_v11 = vsel %vm554_vm2, %v548_v62, %v3600_v3 }
 0x1a7   :  { %2962 = vmatprep.subr.bf16.mxu1 %v2961_v50  ;;  %v2965_v13 = vpack.c.bf16 %v580_v7, %v579_v6  ;;  %v581_v14 = vmax.f32 %v522_v25, %v559_v8  ;;  %v583_v16 = vmax.f32 %v524_v59, %v557_v11  ;;  %v551_v17 = vrot.slane %v527_v5, 1  ;;  %v3127_v59 = vld [vmem:[%s3289_s29 + $0x10] sm:$0xff]   ;;  %s4097_s29 = sld [smem:[#allocation9_spill]] }
 0x1a8   :  { %v556_v20 = vsel %vm554_vm2, %v3600_v3, %v550_v10  ;;  %v705_v18 = vadd.s32 56, %v3555_v44  ;;  %v709_v27 = vand.u32 31, %v3677_v55  ;;  %2830 = vmatprep.subr.bf16.mxu0 %v3127_v59 }
 0x1a9   :  { %v2969_v22 = vpack.c.bf16 %v582_v9, %v581_v14  ;;  %v584_v23 = vmax.f32 %v525_v31, %v556_v20  ;;  %v555_v24 = vsel %vm554_vm2, %v550_v10, %v551_v17  ;;  %v570_v33 = vsel %vm554_vm2, %v551_v17, %v3602_v4  ;;  %v530_v31 = vld [vmem:[%s3284_s25 + $0x10] sm:$0xff]  ;;  %v531_v4 = vld [vmem:[%s3284_s25 + $0x18] sm:$0xff]  ;;  %2831 = vmatpush3.bf16.msra.mxu0 %v3127_v59  ;;  %s4096_s25 = sld [smem:[#allocation8_spill]] }
 0x1aa   :  { %2964 = vmatpush3.bf16.msra.mxu1 %v2961_v50  ;;  %v585_v37 = vmax.f32 %v526_v63, %v555_v24  ;;  %v586_v38 = vmax.f32 %v527_v5, %v570_v33  ;;  %v713_v0 = vand.u32 31, %v705_v18  ;;  %vm3702_vm4 = vcmp.ne.s32.totalorder %v709_v27, 31 }
 0x1ab   :  { %2966 = vmatprep.subr.bf16.mxu1 %v2965_v13  ;;  %v2973_v3 = vpack.c.bf16 %v584_v23, %v583_v16 }
 0x1ac   :  { %v2977_v32 = vpack.c.bf16 %v586_v38, %v585_v37  ;;  %vm754_vm5 = vcmp.ne.s32.totalorder %v713_v0, 31 }
 0x1ae   :  { %2968 = vmatpush3.bf16.msra.mxu1 %v2965_v13 }
 0x1af   :  { %2970 = vmatprep.subr.bf16.mxu1 %v2969_v22 }
 0x1b2   :  { %2972 = vmatpush3.bf16.msra.mxu1 %v2969_v22 }
 0x1b3   :  { %2974 = vmatprep.subr.bf16.mxu1 %v2973_v3 }
 0x1b6   :  { %2976 = vmatpush3.bf16.msra.mxu1 %v2973_v3 }
 0x1b7   :  { %2978 = vmatprep.subr.bf16.mxu1 %v2977_v32 }
 0x1ba   :  { %2980 = vmatpush3.bf16.msra.mxu1 %v2977_v32 }
 0x1bd   :  { %2815 = vmatmul.mubr.f32.vlgmr.msra.gmra.mrb[0].mxu1 %v529_v12 }
 0x1be   :  { %2817 = vmatprep.mubr.f32.mxu1 %v530_v31 }
 0x1c1   :  { %2818 = vmatmul.mubr.f32.gmra.mrb[2].mxu1 %v531_v4 }
 0x1c2   :  { %2820 = vmatprep.mubr.f32.mxu1 %v532_v39 }
 0x1c5   :  { %2821 = vmatmul.mubr.f32.gmra.mrb[4].mxu1 %v533_v40  ;;  %v706_v40 = vand.u32 31, %v3555_v44 }
 0x1c6   :  { %2823 = vmatprep.mubr.f32.mxu1 %v534_v34 }
 0x1c7   :  { %vm714_vm6 = vcmp.ne.s32.totalorder %v706_v40, 0 }
 0x1c9   :  { %2824 = vmatmul.mubr.f32.gmra.mrb[6].mxu1 %v535_v41  ;;  %v702_v41 = vadd.s32 32, %v3555_v44 }
 0x290   :  { %v2816_v45 = vpop.f32.mrb[0].mxu1 }
 0x291   :  { %v723_v47 = vrot.slane %v2816_v45, 7  ;;  %v756_v48 = vrot.slane %v2816_v45, 1  ;;  %v653_v51 = vpop.f32.mrb[1].mxu1 }
 0x292   :  { %v722_v52 = vrot.slane %v653_v51, 7  ;;  %v755_v53 = vrot.slane %v653_v51, 1  ;;  %v3048_v54 = vpack.i.bf16 %v2816_v45, %v653_v51 }
 0x294   :  { %v3681_v15 = vsel %vm730_vm3, %v722_v52, %v723_v47  ;;  %3049 = vrot.lane.b32.xlu0 %v3048_v54, %s3243_s0  ;;  %v2819_v19 = vpop.f32.mrb[2].mxu1  ;;  %v769_v56 = vsel %vm554_vm2, %v755_v53, %v756_v48 }
 0x295   :  { %v725_v57 = vrot.slane %v2819_v19, 7  ;;  %v758_v36 = vrot.slane %v2819_v19, 1  ;;  %v663_v21 = vpop.f32.mrb[3].mxu1 }
 0x296   :  { %v3053_v25 = vpack.i.bf16 %v2819_v19, %v663_v21  ;;  %v724_v58 = vrot.slane %v663_v21, 7  ;;  %v757_v26 = vrot.slane %v663_v21, 1 }
 0x298   :  { %v3691_v29 = vsel %vm730_vm3, %v724_v58, %v725_v57  ;;  %v3695_v28 = vsel %vm730_vm3, %v723_v47, %v724_v58  ;;  %3054 = vrot.lane.b32.xlu0 %v3053_v25, %s3243_s0  ;;  %v2822_v30 = vpop.f32.mrb[4].mxu1  ;;  %v768_v60 = vsel %vm554_vm2, %v756_v48, %v757_v26  ;;  %v767_v61 = vsel %vm554_vm2, %v757_v26, %v758_v36 }
 0x299   :  { %v727_v35 = vrot.slane %v2822_v30, 7  ;;  %v760_v49 = vrot.slane %v2822_v30, 1  ;;  %v673_v62 = vpop.f32.mrb[5].mxu1  ;;  %v3058_v63 = vpack.i.bf16 %v768_v60, %v769_v56 }
 0x29a   :  { %v3063_v1 = vpack.i.bf16 %v2822_v30, %v673_v62  ;;  %v726_v5 = vrot.slane %v673_v62, 7  ;;  %v759_v50 = vrot.slane %v673_v62, 1 }
 0x29b   :  { %3059 = vrot.lane.b32.xlu1 %v3058_v63, %s3244_s5 }
 0x29c   :  { %v3709_v7 = vsel %vm730_vm3, %v726_v5, %v727_v35  ;;  %v3713_v2 = vsel %vm730_vm3, %v725_v57, %v726_v5  ;;  %3064 = vrot.lane.b32.xlu0 %v3063_v1, %s3243_s0  ;;  %v2825_v8 = vpop.f32.mrb[6].mxu1  ;;  %v766_v9 = vsel %vm554_vm2, %v758_v36, %v759_v50  ;;  %v765_v10 = vsel %vm554_vm2, %v759_v50, %v760_v49 }
 0x29d   :  { %v729_v11 = vrot.slane %v2825_v8, 7  ;;  %v762_v13 = vrot.slane %v2825_v8, 1  ;;  %v683_v14 = vpop.f32.mrb[7].mxu1  ;;  %v774_v16 = vsel %vm3702_vm4, %v766_v9, 0.0 }
 0x29e   :  { %v3073_v17 = vpack.i.bf16 %v2825_v8, %v683_v14  ;;  %v728_v20 = vrot.slane %v683_v14, 7  ;;  %v761_v22 = vrot.slane %v683_v14, 1  ;;  %v3068_v23 = vpack.i.bf16 %v774_v16, %v767_v61 }
 0x29f   :  { %v738_v24 = vsel %vm730_vm3, %v729_v11, %v722_v52  ;;  %v770_v33 = vsel %vm554_vm2, %v762_v13, %v755_v53  ;;  %v710_v52 = vand.u32 31, %v702_v41 }
 0x2a0   :  { %v3728_v37 = vsel %vm730_vm3, %v728_v20, %v729_v11  ;;  %v732_v38 = vsel %vm730_vm3, %v727_v35, %v728_v20  ;;  %3069 = vrot.lane.b32.xlu1 %v3068_v23, %s3244_s5  ;;  %v764_v3 = vsel %vm554_vm2, %v760_v49, %v761_v22  ;;  %v763_v32 = vsel %vm554_vm2, %v761_v22, %v762_v13  ;;  %v1068_v22 = vld [vmem:[%s3309_s19] sm:$0xff] }
 0x2a1   :  { %v3078_v12 = vpack.i.bf16 %v764_v3, %v765_v10  ;;  %v778_v31 = vsel %vm754_vm5, %v770_v33, 0.0  ;;  %v739_v47 = vsel %vm714_vm6, %v738_v24, 0.0  ;;  %vm3747_vm9 = vcmp.ne.s32.totalorder %v710_v52, 0  ;;  %2856 = vmatprep.mubr.msk.f32.mxu1 %vm231_vm0, %v1068_v22  ;;  %v2584_v23 = vld [vmem:[%s3294_s3] ss:$0 sm:$0xff]  ;;  %s4098_s3 = sld [smem:[#allocation10_spill]] }
 0x2a2   :  { %v3083_v4 = vpack.i.bf16 %v778_v31, %v763_v32  ;;  %v743_v62 = vsel %vm3747_vm9, %v3713_v2, 0.0  ;;  %vm2125_vm9 = vcmask 31744  }
 0x2a3   :  { %3079 = vrot.lane.b32.xlu0 %v3078_v12, %s3244_s5 }
 0x2a4   :  { %3074 = vrot.lane.b32.xlu1 %v3073_v17, %s3243_s0 }
 0x2a8   :  { %3084 = vrot.lane.b32.xlu1 %v3083_v4, %s3244_s5 }
 0x306   :  { %v3050_v39 = vpop.permute.xlu0 %3049 }
 0x307   :  { %v3052_v42 = vunpack.i.h.bf16 %v3050_v39  ;;  %v3051_v43 = vunpack.i.l.bf16 %v3050_v39 }
 0x309   :  { %v843_v53 = vsel %vm355_vm1, %v739_v47, %v3051_v43  ;;  %v844_v54 = vsel %vm355_vm1, %v3681_v15, %v3052_v42 }
 0x30a   :  { %v3055_v34 = vpop.permute.xlu0 %3054 }
 0x30b   :  { %v3057_v19 = vunpack.i.h.bf16 %v3055_v34  ;;  %v3056_v56 = vunpack.i.l.bf16 %v3055_v34 }
 0x30d   :  { %v3060_v45 = vpop.permute.xlu1 %3059  ;;  %v845_v15 = vsel %vm355_vm1, %v3695_v28, %v3056_v56  ;;  %v846_v60 = vsel %vm355_vm1, %v3691_v29, %v3057_v19 }
 0x30e   :  { %v3062_v48 = vunpack.i.h.bf16 %v3060_v45  ;;  %v3061_v51 = vunpack.i.l.bf16 %v3060_v45  ;;  %v3065_v21 = vpop.permute.xlu0 %3064 }
 0x30f   :  { %v3067_v26 = vunpack.i.h.bf16 %v3065_v21  ;;  %v3066_v27 = vunpack.i.l.bf16 %v3065_v21 }
 0x310   :  { %v853_v57 = vsel %vm851_vm7, %v844_v54, %v3062_v48  ;;  %v852_v36 = vsel %vm851_vm7, %v843_v53, %v3061_v51 }
 0x311   :  { %v860_v18 = vpack.c.bf16 %v853_v57, %v852_v36  ;;  %v847_v50 = vsel %vm355_vm1, %v743_v62, %v3066_v27  ;;  %v848_v28 = vsel %vm355_vm1, %v3709_v7, %v3067_v26 }
 0x312   :  { %v3070_v58 = vpop.permute.xlu1 %3069 }
 0x313   :  { %v3072_v59 = vunpack.i.h.bf16 %v3070_v58  ;;  %v3071_v30 = vunpack.i.l.bf16 %v3070_v58  ;;  %2832 = vmatprep.mubr.msk.bf16.mxu0 %vm888_vm8, %v860_v18 }
 0x315   :  { %v855_v61 = vsel %vm851_vm7, %v846_v60, %v3072_v59  ;;  %v854_v35 = vsel %vm851_vm7, %v845_v15, %v3071_v30  ;;  %v3080_v49 = vpop.permute.xlu0 %3079 }
 0x316   :  { %v861_v63 = vpack.c.bf16 %v855_v61, %v854_v35  ;;  %v3082_v0 = vunpack.i.h.bf16 %v3080_v49  ;;  %v3081_v1 = vunpack.i.l.bf16 %v3080_v49  ;;  %v3075_v5 = vpop.permute.xlu1 %3074 }
 0x317   :  { %v3077_v8 = vunpack.i.h.bf16 %v3075_v5  ;;  %v3076_v9 = vunpack.i.l.bf16 %v3075_v5 }
 0x318   :  { %v857_v29 = vsel %vm851_vm7, %v848_v28, %v3082_v0  ;;  %v856_v6 = vsel %vm851_vm7, %v847_v50, %v3081_v1  ;;  %2833 = vmatmul.mubr.msk.bf16.vlgmr.msra.gmra.mrb[16].mxu0 %vm888_vm8, %v861_v63 }
 0x319   :  { %v862_v2 = vpack.c.bf16 %v857_v29, %v856_v6  ;;  %v849_v14 = vsel %vm355_vm1, %v732_v38, %v3076_v9  ;;  %v850_v7 = vsel %vm355_vm1, %v3728_v37, %v3077_v8 }
 0x31a   :  { %v3085_v10 = vpop.permute.xlu1 %3084 }
 0x31b   :  { %v3087_v11 = vunpack.i.h.bf16 %v3085_v10  ;;  %v3086_v13 = vunpack.i.l.bf16 %v3085_v10  ;;  %2836 = vmatprep.mubr.msk.bf16.mxu0 %vm888_vm8, %v862_v2 }
 0x31d   :  { %v858_v16 = vsel %vm851_vm7, %v849_v14, %v3086_v13  ;;  %v859_v17 = vsel %vm851_vm7, %v850_v7, %v3087_v11 }
 0x31e   :  { %v863_v20 = vpack.c.bf16 %v859_v17, %v858_v16 }
 0x320   :  { %2837 = vmatmul.mubr.msk.bf16.gmra.mrb[20].mxu0 %vm888_vm8, %v863_v20  ;;  %vm2129_vm8 = vcmask 1043456  }
 0x3eb   :  { %v2834_v24 = vpop.f32.mrb[16].mxu0 }
 0x3ec   :  { %v935_v33 = vpop.f32.mrb[17].mxu0  ;;  %v944_v38 = vadd.f32 %v2834_v24, %v2584_v23 }
 0x3ed   :  { %v936_v3 = vadd.f32 %v2584_v23, %v935_v33  ;;  %v2835_v32 = vpop.f32.mrb[18].mxu0 }
 0x3ee   :  { %v938_v12 = vpop.f32.mrb[19].mxu0  ;;  %v947_v4 = vadd.f32 %v2835_v32, %v2584_v23  ;;  %v971_v34 = vsel %vm851_vm7, %v944_v38, 0.0 }
 0x3ef   :  { %v939_v31 = vadd.f32 %v2584_v23, %v938_v12  ;;  %v968_v37 = vsel %vm851_vm7, %v936_v3, 0.0 }
 0x3f0   :  { %v973_v45 = vsel %vm851_vm7, %v947_v4, 0.0 }
 0x3f1   :  { %v969_v39 = vsel %vm851_vm7, %v939_v31, 0.0 }
 0x3f2   :  { %v970_v40 = vadd.f32 %v969_v39, %v968_v37 }
 0x3f3   :  { %v2838_v41 = vpop.f32.mrb[20].mxu0 }
 0x3f4   :  { %v972_v42 = vadd.f32 %v971_v34, %v970_v40  ;;  %v951_v43 = vpop.f32.mrb[21].mxu0  ;;  %v960_v53 = vadd.f32 %v2838_v41, %v2584_v23 }
 0x3f5   :  { %v952_v47 = vadd.f32 %v2584_v23, %v951_v43  ;;  %v2839_v48 = vpop.f32.mrb[22].mxu0 }
 0x3f6   :  { %v974_v51 = vadd.f32 %v973_v45, %v972_v42  ;;  %v954_v52 = vpop.f32.mrb[23].mxu0  ;;  %v963_v57 = vadd.f32 %v2839_v48, %v2584_v23  ;;  %v979_v18 = vsel %vm851_vm7, %v960_v53, 0.0 }
 0x3f7   :  { %v975_v54 = vsel %vm851_vm7, %v952_v47, 0.0  ;;  %v955_v19 = vadd.f32 %v2584_v23, %v954_v52 }
 0x3f8   :  { %v976_v56 = vadd.f32 %v975_v54, %v974_v51  ;;  %v981_v58 = vsel %vm851_vm7, %v963_v57, 0.0 }
 0x3f9   :  { %v977_v36 = vsel %vm851_vm7, %v955_v19, 0.0 }
 0x3fa   :  { %v978_v21 = vadd.f32 %v977_v36, %v976_v56 }
 0x3fc   :  { %v980_v25 = vadd.f32 %v979_v18, %v978_v21 }
 0x3fe   :  { %v982_v26 = vadd.f32 %v981_v58, %v980_v25 }
 0x400   :  { %v983_v27 = vrot.slane %v982_v26, 4 }
 0x402   :  { %v984_v59 = vadd.f32 %v983_v27, %v982_v26 }
 0x404   :  { %v985_v30 = vrot.slane %v984_v59, 2 }
 0x406   :  { %v986_v15 = vadd.f32 %v985_v30, %v984_v59 }
 0x408   :  { %v987_v60 = vrot.slane %v986_v15, 1 }
 0x40a   :  { %v988_v61 = vadd.f32 %v987_v60, %v986_v15 }
 0x40c   :  { %v990_v35 = vmul.f32 0.015625, %v988_v61 }
 0x40e   :  { %v991_v49 = vsub.f32 %v936_v3, %v990_v35  ;;  %v992_v62 = vsub.f32 %v939_v31, %v990_v35  ;;  %v993_v63 = vsub.f32 %v944_v38, %v990_v35  ;;  %v994_v0 = vsub.f32 %v947_v4, %v990_v35 }
 0x40f   :  { %v995_v1 = vsub.f32 %v952_v47, %v990_v35  ;;  %v996_v5 = vsub.f32 %v955_v19, %v990_v35  ;;  %v997_v50 = vsub.f32 %v960_v53, %v990_v35  ;;  %v998_v28 = vsub.f32 %v963_v57, %v990_v35  ;;  %v966_v47 = vld [vmem:[%s3299_s8] sm:$0x1]  ;;  %s4099_s8 = sld [smem:[#allocation11_spill]] }
 0x410   :  { %v999_v29 = vmul.f32 %v991_v49, %v991_v49  ;;  %v1000_v6 = vmul.f32 %v992_v62, %v992_v62  ;;  %v1001_v8 = vmul.f32 %v993_v63, %v993_v63  ;;  %v1002_v9 = vmul.f32 %v994_v0, %v994_v0  ;;  %v2592_v53 = vld [vmem:[%s3304_s14] ss:$0 sm:$0xff]  ;;  %s4100_s14 = sld [smem:[#allocation12_spill]] }
 0x411   :  { %v1003_v13 = vmul.f32 %v995_v1, %v995_v1  ;;  %v1004_v16 = vmul.f32 %v996_v5, %v996_v5  ;;  %v1005_v22 = vmul.f32 %v997_v50, %v997_v50  ;;  %v1006_v33 = vmul.f32 %v998_v28, %v998_v28 }
 0x412   :  { %v1007_v2 = vsel %vm851_vm7, %v999_v29, 0.0  ;;  %v1008_v10 = vsel %vm851_vm7, %v1000_v6, 0.0  ;;  %v1010_v14 = vsel %vm851_vm7, %v1001_v8, 0.0  ;;  %v1012_v17 = vsel %vm851_vm7, %v1002_v9, 0.0 }
 0x413   :  { %v1009_v11 = vadd.f32 %v1008_v10, %v1007_v2  ;;  %v1014_v23 = vsel %vm851_vm7, %v1003_v13, 0.0  ;;  %v1016_v3 = vsel %vm851_vm7, %v1004_v16, 0.0  ;;  %v1018_v12 = vsel %vm851_vm7, %v1005_v22, 0.0 }
 0x414   :  { %v1020_v31 = vsel %vm851_vm7, %v1006_v33, 0.0 }
 0x415   :  { %v1011_v7 = vadd.f32 %v1010_v14, %v1009_v11 }
 0x417   :  { %v1013_v20 = vadd.f32 %v1012_v17, %v1011_v7 }
 0x419   :  { %v1015_v24 = vadd.f32 %v1014_v23, %v1013_v20 }
 0x41b   :  { %v1017_v32 = vadd.f32 %v1016_v3, %v1015_v24 }
 0x41d   :  { %v1019_v38 = vadd.f32 %v1018_v12, %v1017_v32 }
 0x41f   :  { %v1021_v37 = vadd.f32 %v1020_v31, %v1019_v38 }
 0x421   :  { %v1022_v4 = vrot.slane %v1021_v37, 4 }
 0x423   :  { %v1023_v39 = vadd.f32 %v1022_v4, %v1021_v37 }
 0x425   :  { %v1024_v40 = vrot.slane %v1023_v39, 2 }
 0x427   :  { %v1025_v34 = vadd.f32 %v1024_v40, %v1023_v39 }
 0x429   :  { %v1026_v41 = vrot.slane %v1025_v34, 1 }
 0x42b   :  { %v1027_v42 = vadd.f32 %v1026_v41, %v1025_v34  ;;  %v1069_v41 = vld [vmem:[%s3309_s19 + $0x8] sm:$0xff] }
 0x42d   :  { %v1028_v43 = vmul.f32 0.015625, %v1027_v42  ;;  %v1070_v42 = vld [vmem:[%s3309_s19 + $0x10] sm:$0xff] }
 0x42f   :  { %v1029_v45 = vadd.f32 1e-05, %v1028_v43  ;;  %v1071_v43 = vld [vmem:[%s3309_s19 + $0x18] sm:$0xff]  ;;  %s4101_s19 = sld [smem:[#allocation13_spill]] }
 0x431   :  { %3175 = vrsqrt.f32 %v1029_v45  ;;  %v3128_v45 = vld [vmem:[%s3314_s24] sm:$0xff]  }
 0x432   :  { %2862 = vmatprep.subr.bf16.mxu0 %v3128_v45 }
 0x433   :  { %2863 = vmatpush3.bf16.msra.mxu0 %v3128_v45 }
 0x43b   :  { %v3176_v48 = vpop.eup %3175 }
 0x43c   :  { %v1031_v51 = vmul.f32 %v3176_v48, %v966_v47  ;;  %v3129_v47 = vld [vmem:[%s3314_s24 + $0x8] sm:$0xff]   ;;  %v3130_v48 = vld [vmem:[%s3314_s24 + $0x10] sm:$0xff]  }
 0x43d   :  { %2864 = vmatprep.subr.bf16.mxu0 %v3129_v47 }
 0x43e   :  { %v1036_v52 = vrot.slane %v1031_v51, %v3559_v46  ;;  %2865 = vmatpush3.bf16.msra.mxu0 %v3129_v47  ;;  %v3131_v51 = vld [vmem:[%s3314_s24 + $0x18] sm:$0xff]  }
 0x43f   :  { %2866 = vmatprep.subr.bf16.mxu0 %v3130_v48 }
 0x440   :  { %v1043_v54 = vmul.f32 %v1036_v52, %v996_v5  ;;  %v1038_v19 = vmul.f32 %v1036_v52, %v991_v49  ;;  %v1039_v56 = vmul.f32 %v1036_v52, %v992_v62  ;;  %v1040_v57 = vmul.f32 %v1036_v52, %v993_v63 }
 0x441   :  { %v1041_v36 = vmul.f32 %v1036_v52, %v994_v0  ;;  %v1042_v21 = vmul.f32 %v1036_v52, %v995_v1  ;;  %v1044_v18 = vmul.f32 %v1036_v52, %v997_v50  ;;  %v1045_v25 = vmul.f32 %v1036_v52, %v998_v28 }
 0x442   :  { %v1057_v58 = vadd.f32 %v2592_v53, %v1043_v54  ;;  %v1052_v26 = vadd.f32 %v2592_v53, %v1038_v19  ;;  %v1053_v27 = vadd.f32 %v2592_v53, %v1039_v56  ;;  %v1054_v59 = vadd.f32 %v2592_v53, %v1040_v57  ;;  %2867 = vmatpush3.bf16.msra.mxu0 %v3130_v48  ;;  %v1448_v48 = vld [vmem:[%s3334_s20] sm:$0xff] }
 0x443   :  { %v1055_v30 = vadd.f32 %v2592_v53, %v1041_v36  ;;  %v1056_v15 = vadd.f32 %v2592_v53, %v1042_v21  ;;  %v1058_v60 = vadd.f32 %v2592_v53, %v1044_v18  ;;  %v1059_v61 = vadd.f32 %v2592_v53, %v1045_v25  ;;  %2868 = vmatprep.subr.bf16.mxu0 %v3131_v51  ;;  %v3132_v53 = vld [vmem:[%s3314_s24 + $0x20] sm:$0xff]  }
 0x444   :  { %v1065_v35 = vmax.f32 %v1057_v58, 0.0  ;;  %v1060_v29 = vmax.f32 %v1052_v26, 0.0  ;;  %v1061_v6 = vmax.f32 %v1053_v27, 0.0  ;;  %v1062_v8 = vmax.f32 %v1054_v59, 0.0  ;;  %v3133_v26 = vld [vmem:[%s3314_s24 + $0x28] sm:$0xff]   ;;  %s4102_s24 = sld [smem:[#allocation14_spill]] }
 0x445   :  { %v1063_v5 = vmax.f32 %v1055_v30, 0.0  ;;  %v1064_v49 = vmax.f32 %v1056_v15, 0.0  ;;  %v1066_v62 = vmax.f32 %v1058_v60, 0.0  ;;  %v1067_v63 = vmax.f32 %v1059_v61, 0.0 }
 0x446   :  { %v1077_v0 = vrot.slane %v1065_v35, 1  ;;  %v1072_v1 = vrot.slane %v1060_v29, 1  ;;  %v1073_v50 = vrot.slane %v1061_v6, 1  ;;  %v1074_v28 = vrot.slane %v1062_v8, 1  ;;  %2869 = vmatpush3.bf16.msra.mxu0 %v3131_v51  ;;  %v2597_v51 = vld [vmem:[%s3319_s30] ss:$0 sm:$0xff] }
 0x447   :  { %v1075_v9 = vrot.slane %v1063_v5, 1  ;;  %v1076_v2 = vrot.slane %v1064_v49, 1  ;;  %v1078_v10 = vrot.slane %v1066_v62, 1  ;;  %v1079_v11 = vrot.slane %v1067_v63, 1  ;;  %2870 = vmatprep.subr.bf16.mxu0 %v3132_v53  ;;  %s4103_s30 = sld [smem:[#allocation15_spill]] }
 0x448   :  { %v1085_v13 = vsel %vm554_vm2, %v1073_v50, %v1074_v28  ;;  %v1086_v14 = vsel %vm554_vm2, %v1072_v1, %v1073_v50  ;;  %v3823_v52 = vadd.s32 8, %v3555_v44  ;;  %v1209_v58 = vand.u32 15, %v3677_v55 }
 0x449   :  { %v1088_v7 = vmax.f32 %v1060_v29, %v1086_v14  ;;  %v1089_v16 = vmax.f32 %v1061_v6, %v1085_v13  ;;  %v1083_v17 = vsel %vm554_vm2, %v1075_v9, %v1076_v2  ;;  %v1084_v20 = vsel %vm554_vm2, %v1074_v28, %v1075_v9 }
 0x44a   :  { %v1090_v22 = vmax.f32 %v1062_v8, %v1084_v20  ;;  %v1091_v23 = vmax.f32 %v1063_v5, %v1083_v17  ;;  %v1081_v24 = vsel %vm554_vm2, %v1077_v0, %v1078_v10  ;;  %v1082_v33 = vsel %vm554_vm2, %v1076_v2, %v1077_v0  ;;  %2871 = vmatpush3.bf16.msra.mxu0 %v3132_v53 }
 0x44b   :  { %v2981_v3 = vpack.c.bf16 %v1089_v16, %v1088_v7  ;;  %v1092_v32 = vmax.f32 %v1064_v49, %v1082_v33  ;;  %v1093_v12 = vmax.f32 %v1065_v35, %v1081_v24  ;;  %v1080_v38 = vsel %vm554_vm2, %v1078_v10, %v1079_v11  ;;  %2872 = vmatprep.subr.bf16.mxu0 %v3133_v26 }
 0x44c   :  { %v2985_v31 = vpack.c.bf16 %v1091_v23, %v1090_v22  ;;  %v1087_v37 = vsel %vm554_vm2, %v1079_v11, %v1072_v1  ;;  %v1094_v4 = vmax.f32 %v1066_v62, %v1080_v38  ;;  %v1207_v36 = vand.u32 15, %v3823_v52 }
 0x44d   :  { %2982 = vmatprep.subr.bf16.mxu1 %v2981_v3  ;;  %v2989_v39 = vpack.c.bf16 %v1093_v12, %v1092_v32  ;;  %v1095_v40 = vmax.f32 %v1067_v63, %v1087_v37  ;;  %vm1229_vm11 = vcmp.ne.s32.totalorder %v1209_v58, 15  ;;  %v700_v9 = vadd.s32 16, %v3555_v44 }
 0x44e   :  { %2984 = vmatpush3.bf16.msra.mxu1 %v2981_v3  ;;  %vm1227_vm10 = vcmp.ne.s32.totalorder %v1207_v36, 15  ;;  %2873 = vmatpush3.bf16.msra.mxu0 %v3133_v26  ;;  %v1206_v2 = vand.u32 15, %v3555_v44 }
 0x44f   :  { %2986 = vmatprep.subr.bf16.mxu1 %v2985_v31  ;;  %v2993_v34 = vpack.c.bf16 %v1095_v40, %v1094_v4  ;;  %v1208_v10 = vand.u32 15, %v700_v9 }
 0x450   :  { %vm3851_vm12 = vcmp.ne.s32.totalorder %v1206_v2, 0 }
 0x451   :  { %vm3855_vm13 = vcmp.ne.s32.totalorder %v1208_v10, 0 }
 0x452   :  { %2988 = vmatpush3.bf16.msra.mxu1 %v2985_v31 }
 0x453   :  { %2990 = vmatprep.subr.bf16.mxu1 %v2989_v39 }
 0x456   :  { %2992 = vmatpush3.bf16.msra.mxu1 %v2989_v39 }
 0x457   :  { %2994 = vmatprep.subr.bf16.mxu1 %v2993_v34 }
 0x45a   :  { %2996 = vmatpush3.bf16.msra.mxu1 %v2993_v34 }
 0x45d   :  { %2857 = vmatmul.mubr.msk.f32.vlgmr.msra.gmra.mrb[8].mxu1 %vm231_vm0, %v1069_v41 }
 0x45e   :  { %2859 = vmatprep.mubr.msk.f32.mxu1 %vm231_vm0, %v1070_v42 }
 0x461   :  { %2860 = vmatmul.mubr.msk.f32.gmra.mrb[10].mxu1 %vm231_vm0, %v1071_v43 }
 0x462   :  { %2886 = vmatprep.mubr.msk.f32.mxu1 %vm851_vm7, %v1448_v48 }
 0x530   :  { %v2858_v54 = vpop.f32.mrb[8].mxu1 }
 0x531   :  { %v1215_v19 = vrot.slane %v2858_v54, 7  ;;  %v1231_v56 = vrot.slane %v2858_v54, 1  ;;  %v1174_v57 = vpop.f32.mrb[9].mxu1 }
 0x532   :  { %v3088_v21 = vpack.i.bf16 %v2858_v54, %v1174_v57  ;;  %v1214_v18 = vrot.slane %v1174_v57, 7  ;;  %v1230_v25 = vrot.slane %v1174_v57, 1 }
 0x534   :  { %v1220_v27 = vsel %vm730_vm3, %v1214_v18, %v1215_v19  ;;  %3089 = vrot.lane.b32.xlu0 %v3088_v21, %s3244_s5  ;;  %v2861_v59 = vpop.f32.mrb[10].mxu1  ;;  %v1236_v30 = vsel %vm554_vm2, %v1230_v25, %v1231_v56 }
 0x535   :  { %v1217_v15 = vrot.slane %v2861_v59, 7  ;;  %v1233_v60 = vrot.slane %v2861_v59, 1  ;;  %v1184_v61 = vpop.f32.mrb[11].mxu1 }
 0x536   :  { %v3093_v35 = vpack.i.bf16 %v2861_v59, %v1184_v61  ;;  %v1216_v29 = vrot.slane %v1184_v61, 7  ;;  %v1232_v6 = vrot.slane %v1184_v61, 1 }
 0x537   :  { %v1221_v55 = vsel %vm730_vm3, %v1217_v15, %v1214_v18  ;;  %v1237_v8 = vsel %vm554_vm2, %v1233_v60, %v1230_v25 }
 0x538   :  { %v1218_v5 = vsel %vm730_vm3, %v1216_v29, %v1217_v15  ;;  %v1219_v49 = vsel %vm730_vm3, %v1215_v19, %v1216_v29  ;;  %3094 = vrot.lane.b32.xlu1 %v3093_v35, %s3244_s5  ;;  %v1235_v62 = vsel %vm554_vm2, %v1231_v56, %v1232_v6  ;;  %v1234_v63 = vsel %vm554_vm2, %v1232_v6, %v1233_v60 }
 0x539   :  { %v1239_v0 = vsel %vm1227_vm10, %v1235_v62, 0.0  ;;  %v1241_v1 = vsel %vm1229_vm11, %v1237_v8, 0.0  ;;  %v1222_v23 = vsel %vm3851_vm12, %v1221_v55, 0.0  ;;  %v1224_v24 = vsel %vm3855_vm13, %v1219_v49, 0.0 }
 0x53a   :  { %v3098_v50 = vpack.i.bf16 %v1239_v0, %v1236_v30  ;;  %v3103_v28 = vpack.i.bf16 %v1241_v1, %v1234_v63  ;;  %vm2459_vm10 = vcmask 1041408   ;;  %vm2455_vm11 = vcmask 818176  }
 0x53c   :  { %3099 = vrot.lane.b32.xlu0 %v3098_v50, %s3245_s9  ;;  %3104 = vrot.lane.b32.xlu1 %v3103_v28, %s3245_s9 }
 0x5a6   :  { %v3090_v11 = vpop.permute.xlu0 %3089 }
 0x5a7   :  { %v3092_v16 = vunpack.i.h.bf16 %v3090_v11  ;;  %v3091_v17 = vunpack.i.l.bf16 %v3090_v11 }
 0x5a9   :  { %v1274_v37 = vsel %vm851_vm7, %v1222_v23, %v3091_v17  ;;  %v1275_v4 = vsel %vm851_vm7, %v1220_v27, %v3092_v16 }
 0x5aa   :  { %v3095_v13 = vpop.permute.xlu1 %3094 }
 0x5ab   :  { %v3097_v20 = vunpack.i.h.bf16 %v3095_v13  ;;  %v3096_v22 = vunpack.i.l.bf16 %v3095_v13 }
 0x5ad   :  { %v1276_v39 = vsel %vm851_vm7, %v1224_v24, %v3096_v22  ;;  %v1277_v40 = vsel %vm851_vm7, %v1218_v5, %v3097_v20 }
 0x5ae   :  { %v3100_v33 = vpop.permute.xlu0 %3099  ;;  %v3105_v3 = vpop.permute.xlu1 %3104 }
 0x5af   :  { %v3102_v32 = vunpack.i.h.bf16 %v3100_v33  ;;  %v3101_v12 = vunpack.i.l.bf16 %v3100_v33  ;;  %v3107_v38 = vunpack.i.h.bf16 %v3105_v3  ;;  %v3106_v31 = vunpack.i.l.bf16 %v3105_v3 }
 0x5b1   :  { %v1279_v34 = vsel %vm231_vm0, %v1275_v4, %v3102_v32  ;;  %v1278_v41 = vsel %vm231_vm0, %v1274_v37, %v3101_v12  ;;  %v1280_v42 = vsel %vm231_vm0, %v1276_v39, %v3106_v31  ;;  %v1281_v43 = vsel %vm231_vm0, %v1277_v40, %v3107_v38  ;;  %v1382_v32 = vld [vmem:[%s4087_s13] sm:$0x1] }
 0x5b2   :  { %v1282_v45 = vpack.c.bf16 %v1279_v34, %v1278_v41  ;;  %v1283_v47 = vpack.c.bf16 %v1281_v43, %v1280_v42  ;;  %v2606_v37 = vld [vmem:[%s4088_s17] ss:$0 sm:$0xff] }
 0x5b4   :  { %2874 = vmatprep.mubr.msk.bf16.mxu0 %vm1326_vm14, %v1282_v45 }
 0x5b5   :  { %2875 = vmatmul.mubr.msk.bf16.vlgmr.msra.gmra.mrb[24].mxu0 %vm1326_vm14, %v1283_v47 }
 0x688   :  { %v2876_v53 = vpop.f32.mrb[24].mxu0 }
 0x689   :  { %v1367_v54 = vpop.f32.mrb[25].mxu0  ;;  %v1376_v36 = vadd.f32 %v2876_v53, %v2597_v51 }
 0x68a   :  { %v1368_v19 = vadd.f32 %v2597_v51, %v1367_v54  ;;  %v2877_v56 = vpop.f32.mrb[26].mxu0 }
 0x68b   :  { %v1370_v57 = vpop.f32.mrb[27].mxu0  ;;  %v1379_v25 = vadd.f32 %v2877_v56, %v2597_v51  ;;  %v1387_v27 = vsel %vm231_vm0, %v1376_v36, 0.0 }
 0x68c   :  { %v1371_v21 = vadd.f32 %v2597_v51, %v1370_v57  ;;  %v1384_v18 = vsel %vm231_vm0, %v1368_v19, 0.0 }
 0x68d   :  { %v1389_v30 = vsel %vm231_vm0, %v1379_v25, 0.0 }
 0x68e   :  { %v1385_v58 = vsel %vm231_vm0, %v1371_v21, 0.0 }
 0x68f   :  { %v1386_v26 = vadd.f32 %v1385_v58, %v1384_v18 }
 0x691   :  { %v1388_v59 = vadd.f32 %v1387_v27, %v1386_v26 }
 0x693   :  { %v1390_v15 = vadd.f32 %v1389_v30, %v1388_v59 }
 0x695   :  { %v1391_v60 = vrot.slane %v1390_v15, 4 }
 0x697   :  { %v1392_v61 = vadd.f32 %v1391_v60, %v1390_v15  ;;  %v1449_v60 = vld [vmem:[%s3334_s20 + $0x8] sm:$0xff]  ;;  %s4104_s20 = sld [smem:[#allocation16_spill]] }
 0x699   :  { %v1393_v35 = vrot.slane %v1392_v61, 2 }
 0x69b   :  { %v1394_v29 = vadd.f32 %v1393_v35, %v1392_v61  ;;  %v3134_v61 = vld [vmem:[%s4089_s21] sm:$0xff]   ;;  %v3246_v35 = vmov 0  }
 0x69d   :  { %v1395_v6 = vrot.slane %v1394_v29, 1 }
 0x69f   :  { %v1396_v55 = vadd.f32 %v1395_v6, %v1394_v29  ;;  %v3135_v29 = vld [vmem:[%s4089_s21 + $0x8] sm:$0xff]   ;;  %v3136_v6 = vld [vmem:[%s4089_s21 + $0x10] sm:$0xff]  }
 0x6a1   :  { %v1398_v8 = vmul.f32 0.03125, %v1396_v55  ;;  %v3137_v55 = vld [vmem:[%s4089_s21 + $0x18] sm:$0xff]  }
 0x6a3   :  { %v1399_v5 = vsub.f32 %v1368_v19, %v1398_v8  ;;  %v1400_v49 = vsub.f32 %v1371_v21, %v1398_v8  ;;  %v1401_v62 = vsub.f32 %v1376_v36, %v1398_v8  ;;  %v1402_v63 = vsub.f32 %v1379_v25, %v1398_v8  ;;  %v3138_v8 = vld [vmem:[%s4089_s21 + $0x20] sm:$0xff]  }
 0x6a5   :  { %v1403_v0 = vmul.f32 %v1399_v5, %v1399_v5  ;;  %v1404_v1 = vmul.f32 %v1400_v49, %v1400_v49  ;;  %v1405_v50 = vmul.f32 %v1401_v62, %v1401_v62  ;;  %v1406_v28 = vmul.f32 %v1402_v63, %v1402_v63 }
 0x6a7   :  { %v1407_v9 = vsel %vm231_vm0, %v1403_v0, 0.0  ;;  %v1408_v2 = vsel %vm231_vm0, %v1404_v1, 0.0  ;;  %v1410_v11 = vsel %vm231_vm0, %v1405_v50, 0.0  ;;  %v1412_v14 = vsel %vm231_vm0, %v1406_v28, 0.0  ;;  %v3143_v0 = vld [vmem:[%s4089_s21 + $0x48] sm:$0xff]   ;;  %v3144_v1 = vld [vmem:[%s4089_s21 + $0x50] sm:$0xff]  }
 0x6a8   :  { %v1409_v10 = vadd.f32 %v1408_v2, %v1407_v9  ;;  %v3145_v50 = vld [vmem:[%s4089_s21 + $0x58] sm:$0xff]   ;;  %v1569_v28 = vand.u32 7, %v3823_v52  ;;  %v1568_v9 = vand.u32 7, %v3555_v44 }
 0x6aa   :  { %v1411_v13 = vadd.f32 %v1410_v11, %v1409_v10  ;;  %vm3923_vm15 = vcmp.ne.s32.totalorder %v1569_v28, 7  ;;  %vm1578_vm4 = vcmp.ne.s32.totalorder %v1568_v9, 7  ;;  %vm3927_vm5 = vcmp.ne.s32.totalorder %v1568_v9, 0 }
 0x6ab   :  { %vm3931_vm6 = vcmp.ne.s32.totalorder %v1569_v28, 0  ;;  %v1720_v28 = vld [vmem:[%s4097_s29] sm:$0x1] }
 0x6ac   :  { %v1413_v7 = vadd.f32 %v1412_v14, %v1411_v13 }
 0x6ae   :  { %v1414_v16 = vrot.slane %v1413_v7, 4 }
 0x6b0   :  { %v1415_v17 = vadd.f32 %v1414_v16, %v1413_v7 }
 0x6b2   :  { %v1416_v20 = vrot.slane %v1415_v17, 2 }
 0x6b4   :  { %v1417_v22 = vadd.f32 %v1416_v20, %v1415_v17 }
 0x6b6   :  { %v1418_v23 = vrot.slane %v1417_v22, 1 }
 0x6b8   :  { %v1419_v24 = vadd.f32 %v1418_v23, %v1417_v22 }
 0x6ba   :  { %v1420_v33 = vmul.f32 0.03125, %v1419_v24 }
 0x6bc   :  { %v1421_v3 = vadd.f32 1e-05, %v1420_v33 }
 0x6be   :  { %3177 = vrsqrt.f32 %v1421_v3 }
 0x6c8   :  { %v3178_v12 = vpop.eup %3177 }
 0x6c9   :  { %v1423_v38 = vmul.f32 %v3178_v12, %v1382_v32 }
 0x6cb   :  { %v1428_v31 = vrot.slane %v1423_v38, %v3559_v46 }
 0x6cd   :  { %v1431_v4 = vmul.f32 %v1428_v31, %v1400_v49  ;;  %v1430_v39 = vmul.f32 %v1428_v31, %v1399_v5  ;;  %v1432_v40 = vmul.f32 %v1428_v31, %v1401_v62  ;;  %v1433_v34 = vmul.f32 %v1428_v31, %v1402_v63  ;;  %v3139_v5 = vld [vmem:[%s4089_s21 + $0x28] sm:$0xff]   ;;  %v3140_v49 = vld [vmem:[%s4089_s21 + $0x30] sm:$0xff]   ;;  %v3141_v62 = vld [vmem:[%s4089_s21 + $0x38] sm:$0xff]  }
 0x6ce   :  { %v3142_v63 = vld [vmem:[%s4089_s21 + $0x40] sm:$0xff]  }
 0x6cf   :  { %v1441_v41 = vadd.f32 %v2606_v37, %v1431_v4  ;;  %v1440_v42 = vadd.f32 %v2606_v37, %v1430_v39  ;;  %v1442_v43 = vadd.f32 %v2606_v37, %v1432_v40  ;;  %v1443_v45 = vadd.f32 %v2606_v37, %v1433_v34 }
 0x6d1   :  { %v1445_v47 = vmax.f32 %v1441_v41, 0.0  ;;  %v1444_v48 = vmax.f32 %v1440_v42, 0.0  ;;  %v1446_v51 = vmax.f32 %v1442_v43, 0.0  ;;  %v1447_v53 = vmax.f32 %v1443_v45, 0.0  ;;  %v2609_v45 = vld [vmem:[%s4096_s25] ss:$0 sm:$0xff] }
 0x6d2   :  { %v3247_v42 = vmov 0.0|0.0   ;;  %v3249_v43 = vmov 0.0  }
 0x6d3   :  { %v1451_v54 = vrot.slane %v1445_v47, 1  ;;  %v1450_v19 = vrot.slane %v1444_v48, 1  ;;  %v1452_v56 = vrot.slane %v1446_v51, 1  ;;  %v1453_v57 = vrot.slane %v1447_v53, 1  ;;  %3005 = vmatprep.subr.bf16.mxu0 %v3247_v42  ;;  %v3154_v42 = vld [vmem:[%s4100_s14 + $0x40] sm:$0xff]  }
 0x6d5   :  { %v1455_v36 = vsel %vm554_vm2, %v1451_v54, %v1452_v56  ;;  %v1456_v21 = vsel %vm554_vm2, %v1450_v19, %v1451_v54  ;;  %v1454_v18 = vsel %vm554_vm2, %v1452_v56, %v1453_v57  ;;  %v1457_v25 = vsel %vm554_vm2, %v1453_v57, %v1450_v19 }
 0x6d6   :  { %v1458_v58 = vmax.f32 %v1444_v48, %v1456_v21  ;;  %v1459_v26 = vmax.f32 %v1445_v47, %v1455_v36  ;;  %v1460_v27 = vmax.f32 %v1446_v51, %v1454_v18  ;;  %v1461_v59 = vmax.f32 %v1447_v53, %v1457_v25 }
 0x6d8   :  { %v2997_v30 = vpack.c.bf16 %v1459_v26, %v1458_v58  ;;  %v3001_v15 = vpack.c.bf16 %v1461_v59, %v1460_v27 }
 0x6da   :  { %2998 = vmatprep.subr.bf16.mxu1 %v2997_v30 }
 0x6db   :  { %3000 = vmatpush3.bf16.msra.mxu1 %v2997_v30 }
 0x6dc   :  { %3002 = vmatprep.subr.bf16.mxu1 %v3001_v15 }
 0x6df   :  { %3004 = vmatpush3.bf16.msra.mxu1 %v3001_v15 }
 0x6e0   :  { %1679 = vmatprep.subr.bf16.mxu1 %v3246_v35 }
 0x6e2   :  { %2887 = vmatmul.mubr.msk.f32.vlgmr.msra.gmra.mrb[12].mxu1 %vm851_vm7, %v1449_v60  ;;  %vm2050_vm7 = vcmask 64512  }
 0x6e3   :  { %1680 = vmatpush1.bf16.msra.mxu1 %v3134_v61 }
 0x6e4   :  { %1681 = vmatprep.subr.bf16.mxu1 %v3246_v35 }
 0x6e7   :  { %1682 = vmatpush1.bf16.msra.mxu1 %v3135_v29 }
 0x6e8   :  { %1683 = vmatprep.subr.bf16.mxu1 %v3246_v35 }
 0x6eb   :  { %1684 = vmatpush1.bf16.msra.mxu1 %v3136_v6 }
 0x6ec   :  { %1685 = vmatprep.subr.bf16.mxu1 %v3246_v35 }
 0x6ef   :  { %1686 = vmatpush1.bf16.msra.mxu1 %v3137_v55 }
 0x6f0   :  { %1687 = vmatprep.subr.bf16.mxu1 %v3246_v35 }
 0x6f3   :  { %1688 = vmatpush1.bf16.msra.mxu1 %v3138_v8 }
 0x6f4   :  { %1689 = vmatprep.subr.bf16.mxu1 %v3246_v35 }
 0x6f7   :  { %1690 = vmatpush1.bf16.msra.mxu1 %v3139_v5 }
 0x6f8   :  { %1691 = vmatprep.subr.bf16.mxu1 %v3246_v35 }
 0x6fb   :  { %1692 = vmatpush1.bf16.msra.mxu1 %v3140_v49 }
 0x6fc   :  { %1693 = vmatprep.subr.bf16.mxu1 %v3246_v35 }
 0x6ff   :  { %1694 = vmatpush1.bf16.msra.mxu1 %v3141_v62 }
 0x700   :  { %1695 = vmatprep.subr.bf16.mxu1 %v3246_v35 }
 0x703   :  { %1696 = vmatpush1.bf16.msra.mxu1 %v3142_v63 }
 0x704   :  { %1697 = vmatprep.subr.bf16.mxu1 %v3246_v35 }
 0x707   :  { %1698 = vmatpush1.bf16.msra.mxu1 %v3143_v0 }
 0x708   :  { %1699 = vmatprep.subr.bf16.mxu1 %v3246_v35 }
 0x70b   :  { %1700 = vmatpush1.bf16.msra.mxu1 %v3144_v1 }
 0x70c   :  { %1701 = vmatprep.subr.bf16.mxu1 %v3246_v35 }
 0x70f   :  { %1702 = vmatpush1.bf16.msra.mxu1 %v3145_v50 }
 0x710   :  { %2896 = vmatprep.subr.mxu1 %v3249_v43 }
 0x7b5   :  { %v2888_v2 = vpop.f32.mrb[12].mxu1 }
 0x7b6   :  { %v1573_v11 = vrot.slane %v2888_v2, 7  ;;  %v1581_v13 = vrot.slane %v2888_v2, 1  ;;  %v1534_v14 = vpop.f32.mrb[13].mxu1 }
 0x7b7   :  { %v3108_v16 = vpack.i.bf16 %v2888_v2, %v1534_v14  ;;  %v1572_v17 = vrot.slane %v1534_v14, 7  ;;  %v1580_v20 = vrot.slane %v1534_v14, 1 }
 0x7b9   :  { %v1574_v22 = vsel %vm730_vm3, %v1572_v17, %v1573_v11  ;;  %v1575_v23 = vsel %vm730_vm3, %v1573_v11, %v1572_v17  ;;  %v1582_v24 = vsel %vm554_vm2, %v1580_v20, %v1581_v13  ;;  %v1583_v33 = vsel %vm554_vm2, %v1581_v13, %v1580_v20  ;;  %3109 = vrot.lane.b32.xlu0 %v3108_v16, %s3245_s9  ;;  %v2623_v11 = vld [vmem:[%s4098_s3] ss:$0 sm:$0xff] }
 0x7ba   :  { %v1584_v3 = vsel %vm1578_vm4, %v1582_v24, 0.0  ;;  %v1585_v32 = vsel %vm3923_vm15, %v1583_v33, 0.0  ;;  %v1576_v12 = vsel %vm3927_vm5, %v1575_v23, 0.0  ;;  %v1577_v38 = vsel %vm3931_vm6, %v1574_v22, 0.0 }
 0x7bb   :  { %v1597_v31 = vpack.c.bf16 %v1585_v32, %v1584_v3  ;;  %vm3248_vm3 = vmmov 0  }
 0x7bc   :  { %2893 = vmatprep.mubr.msk.f32.mxu0 %vm3248_vm3, %v3249_v43 }
 0x7bd   :  { %2622 = vmatprep.mubr.msk.bf16.mxu1 %vm231_vm0, %v1597_v31  ;;  %v3147_v31 = vld [vmem:[%s4100_s14 + $0x8] sm:$0xff]  }
 0x82b   :  { %v3110_v37 = vpop.permute.xlu0 %3109 }
 0x82c   :  { %v3112_v4 = vunpack.i.h.bf16 %v3110_v37  ;;  %v3111_v39 = vunpack.i.l.bf16 %v3110_v37  ;;  %v3148_v37 = vld [vmem:[%s4100_s14 + $0x10] sm:$0xff]  }
 0x82e   :  { %v1594_v40 = vsel %vm231_vm0, %v1576_v12, %v3111_v39  ;;  %v1595_v34 = vsel %vm231_vm0, %v1577_v38, %v3112_v4  ;;  %v1768_v12 = vld [vmem:[%s4099_s8] sm:$0xff]  ;;  %v3149_v4 = vld [vmem:[%s4100_s14 + $0x18] sm:$0xff]  }
 0x82f   :  { %v1596_v41 = vpack.c.bf16 %v1595_v34, %v1594_v40  ;;  %v3146_v38 = vld [vmem:[%s4100_s14] sm:$0xff]   ;;  %v3151_v40 = vld [vmem:[%s4100_s14 + $0x28] sm:$0xff]   ;;  %v3152_v34 = vld [vmem:[%s4100_s14 + $0x30] sm:$0xff]  }
 0x830   :  { %v3150_v39 = vld [vmem:[%s4100_s14 + $0x20] sm:$0xff]  }
 0x831   :  { %1712 = vmatmul.mubr.bf16.vlgmr.msra.gmra.mrb[16].mxu1 %v1596_v41  ;;  %v3153_v41 = vld [vmem:[%s4100_s14 + $0x38] sm:$0xff]  }
 0x832   :  { %2898 = vmatprep.mubr.msk.f32.mxu1 %vm3248_vm3, %v3249_v43 }
 0x904   :  { %v1713_v47 = vpop.f32.mrb[16].mxu1 }
 0x905   :  { %v1714_v48 = vadd.f32 %v2609_v45, %v1713_v47  ;;  %v1715_v51 = vpop.f32.mrb[17].mxu1  ;;  %v3156_v47 = vld [vmem:[%s4100_s14 + $0x50] sm:$0xff]  }
 0x906   :  { %v1716_v53 = vpop.f32.mrb[18].mxu1  ;;  %v1873_v51 = vand.u32 3, %v3555_v44  ;;  %v2625_v44 = vld [vmem:[%s4101_s19] ss:$0 sm:$0xff] }
 0x907   :  { %v1717_v54 = vadd.f32 %v2609_v45, %v1716_v53  ;;  %v1718_v19 = vpop.f32.mrb[19].mxu1  ;;  %v1722_v56 = vsel %vm231_vm0, %v1714_v48, 0.0  ;;  %v3155_v45 = vld [vmem:[%s4100_s14 + $0x48] sm:$0xff]  }
 0x909   :  { %v1723_v57 = vsel %vm231_vm0, %v1717_v54, 0.0 }
 0x90a   :  { %v1724_v36 = vadd.f32 %v1723_v57, %v1722_v56 }
 0x90c   :  { %v1725_v21 = vrot.slane %v1724_v36, 4 }
 0x90e   :  { %v1726_v18 = vadd.f32 %v1725_v21, %v1724_v36 }
 0x910   :  { %v1727_v25 = vrot.slane %v1726_v18, 2 }
 0x912   :  { %v1728_v58 = vadd.f32 %v1727_v25, %v1726_v18 }
 0x914   :  { %v1729_v26 = vrot.slane %v1728_v58, 1 }
 0x916   :  { %v1730_v27 = vadd.f32 %v1729_v26, %v1728_v58 }
 0x918   :  { %v1732_v59 = vmul.f32 0.0625, %v1730_v27 }
 0x91a   :  { %v1733_v30 = vsub.f32 %v1714_v48, %v1732_v59  ;;  %v1734_v15 = vsub.f32 %v1717_v54, %v1732_v59  ;;  %v3157_v48 = vld [vmem:[%s4100_s14 + $0x58] sm:$0xff]  }
 0x91c   :  { %v1735_v60 = vmul.f32 %v1733_v30, %v1733_v30  ;;  %v1736_v61 = vmul.f32 %v1734_v15, %v1734_v15 }
 0x91e   :  { %v1737_v29 = vsel %vm231_vm0, %v1735_v60, 0.0  ;;  %v1738_v6 = vsel %vm231_vm0, %v1736_v61, 0.0 }
 0x91f   :  { %v1739_v55 = vadd.f32 %v1738_v6, %v1737_v29 }
 0x921   :  { %v1740_v8 = vrot.slane %v1739_v55, 4 }
 0x923   :  { %v1741_v5 = vadd.f32 %v1740_v8, %v1739_v55 }
 0x925   :  { %v1742_v49 = vrot.slane %v1741_v5, 2 }
 0x927   :  { %v1743_v62 = vadd.f32 %v1742_v49, %v1741_v5 }
 0x929   :  { %v1744_v63 = vrot.slane %v1743_v62, 1 }
 0x92b   :  { %v1745_v0 = vadd.f32 %v1744_v63, %v1743_v62 }
 0x92d   :  { %v1746_v1 = vmul.f32 0.0625, %v1745_v0 }
 0x92f   :  { %v1747_v50 = vadd.f32 1e-05, %v1746_v1 }
 0x931   :  { %3179 = vrsqrt.f32 %v1747_v50 }
 0x93b   :  { %v3180_v9 = vpop.eup %3179 }
 0x93c   :  { %v1749_v2 = vmul.f32 %v3180_v9, %v1720_v28 }
 0x93e   :  { %v1754_v10 = vrot.slane %v1749_v2, %v3559_v46 }
 0x940   :  { %v1756_v13 = vmul.f32 %v1754_v10, %v1733_v30  ;;  %v1757_v14 = vmul.f32 %v1754_v10, %v1734_v15 }
 0x942   :  { %v1764_v7 = vadd.f32 %v2623_v11, %v1756_v13  ;;  %v1765_v16 = vadd.f32 %v2623_v11, %v1757_v14  ;;  %v2008_v13 = vld [vmem:[%s4102_s24] sm:$0x1] }
 0x944   :  { %v1766_v17 = vmax.f32 %v1764_v7, 0.0  ;;  %v1767_v20 = vmax.f32 %v1765_v16, 0.0 }
 0x946   :  { %v1769_v52 = vrot.slane %v1766_v17, 1  ;;  %v1770_v22 = vrot.slane %v1767_v20, 1 }
 0x948   :  { %v1772_v23 = vsel %vm554_vm2, %v1770_v22, %v1769_v52  ;;  %v1771_v24 = vsel %vm554_vm2, %v1769_v52, %v1770_v22  ;;  %vm1874_vm2 = vcmp.ne.s32.totalorder %v1873_v51, 0 }
 0x949   :  { %v1774_v33 = vmax.f32 %v1767_v20, %v1772_v23  ;;  %v1773_v3 = vmax.f32 %v1766_v17, %v1771_v24  ;;  %v2639_v17 = vld [vmem:[%s4103_s30] ss:$0 sm:$0xff] }
 0x94b   :  { %v3006_v32 = vpack.c.bf16 %v1774_v33, %v1773_v3  ;;  %v2047_v33 = vld [vmem:[%s4104_s20] sm:$0xf] }
 0x94d   :  { %3007 = vmatpush3.bf16.msra.mxu0 %v3006_v32 }
 0x94e   :  { %1968 = vmatprep.subr.bf16.mxu0 %v3246_v35 }
 0x950   :  { %2894 = vmatmul.mubr.msk.f32.vlgmr.msra.gmra.mrb[28].mxu0 %vm355_vm1, %v1768_v12  ;;  %vm1877_vm1 = vcmp.ne.s32.totalorder %v1873_v51, 3  ;;  %v2203_v12 = vld [vmem:[%s4106_s1] sm:$0x3]  ;;  %v3168_v51 = vld [vmem:[%s3409_s12 + $0x10] sm:$0xff]  }
 0x951   :  { %1969 = vmatpush1.bf16.msra.mxu0 %v3146_v38  ;;  %v3158_v38 = vld [vmem:[%s4107_s2] sm:$0xff]  }
 0x952   :  { %1970 = vmatprep.subr.bf16.mxu0 %v3246_v35 }
 0x955   :  { %1971 = vmatpush1.bf16.msra.mxu0 %v3147_v31  ;;  %v3159_v31 = vld [vmem:[%s4107_s2 + $0x8] sm:$0xff]  }
 0x956   :  { %1972 = vmatprep.subr.bf16.mxu0 %v3246_v35 }
 0x959   :  { %1973 = vmatpush1.bf16.msra.mxu0 %v3148_v37  ;;  %v3160_v37 = vld [vmem:[%s4107_s2 + $0x10] sm:$0xff]  }
 0x95a   :  { %1974 = vmatprep.subr.bf16.mxu0 %v3246_v35 }
 0x95d   :  { %1975 = vmatpush1.bf16.msra.mxu0 %v3149_v4  ;;  %v3161_v4 = vld [vmem:[%s4107_s2 + $0x18] sm:$0xff]  }
 0x95e   :  { %1976 = vmatprep.subr.bf16.mxu0 %v3246_v35 }
 0x961   :  { %1977 = vmatpush1.bf16.msra.mxu0 %v3150_v39  ;;  %v3162_v39 = vld [vmem:[%s4107_s2 + $0x20] sm:$0xff]  }
 0x962   :  { %1978 = vmatprep.subr.bf16.mxu0 %v3246_v35 }
 0x965   :  { %1979 = vmatpush1.bf16.msra.mxu0 %v3151_v40  ;;  %v3163_v40 = vld [vmem:[%s4107_s2 + $0x28] sm:$0xff]  }
 0x966   :  { %1980 = vmatprep.subr.bf16.mxu0 %v3246_v35 }
 0x969   :  { %1981 = vmatpush1.bf16.msra.mxu0 %v3152_v34  ;;  %v3164_v34 = vld [vmem:[%s4107_s2 + $0x30] sm:$0xff]  }
 0x96a   :  { %1982 = vmatprep.subr.bf16.mxu0 %v3246_v35 }
 0x96d   :  { %1983 = vmatpush1.bf16.msra.mxu0 %v3153_v41  ;;  %v3165_v41 = vld [vmem:[%s4107_s2 + $0x38] sm:$0xff]  }
 0x96e   :  { %1984 = vmatprep.subr.bf16.mxu0 %v3246_v35 }
 0x971   :  { %1985 = vmatpush1.bf16.msra.mxu0 %v3154_v42  ;;  %v3166_v42 = vld [vmem:[%s3409_s12] sm:$0xff]  }
 0x972   :  { %1986 = vmatprep.subr.bf16.mxu0 %v3246_v35 }
 0x975   :  { %1987 = vmatpush1.bf16.msra.mxu0 %v3155_v45  ;;  %v3167_v45 = vld [vmem:[%s3409_s12 + $0x8] sm:$0xff]  }
 0x976   :  { %1988 = vmatprep.subr.bf16.mxu0 %v3246_v35 }
 0x979   :  { %1989 = vmatpush1.bf16.msra.mxu0 %v3156_v47 }
 0x97a   :  { %1990 = vmatprep.subr.bf16.mxu0 %v3246_v35 }
 0x97d   :  { %1991 = vmatpush1.bf16.msra.mxu0 %v3157_v48 }
 0x97e   :  { %2931 = vmatprep.subr.bf16.mxu0 %v3249_v43 }
 0xa23   :  { %v1844_v53 = vpop.f32.mrb[28].mxu0 }
 0xa24   :  { %v1875_v54 = vrot.slane %v1844_v53, 7  ;;  %v1878_v19 = vrot.slane %v1844_v53, 1  ;;  %1881 = vrot.lane.b32.xlu1 %v1844_v53, %s3245_s9  ;;  %v2895_v56 = vpop.f32.mrb[29].mxu0 }
 0xa25   :  { %v3170_v56 = vld [vmem:[%s3409_s12 + $0x20] sm:$0xff]  }
 0xa26   :  { %v1879_v57 = vsel %vm1877_vm1, %v1878_v19, 0.0  ;;  %v1876_v36 = vsel %vm1874_vm2, %v1875_v54, 0.0  ;;  %v3169_v19 = vld [vmem:[%s3409_s12 + $0x18] sm:$0xff]  }
 0xa27   :  { %v1886_v21 = vpack.c.bf16 %v1879_v57, %v1879_v57 }
 0xa29   :  { %2638 = vmatprep.mubr.msk.bf16.mxu0 %vm231_vm0, %v1886_v21 }
 0xa96   :  { %v1882_v35 = vpop.permute.xlu1 %1881 }
 0xa97   :  { %v1884_v18 = vsel %vm231_vm0, %v1876_v36, %v1882_v35  ;;  %v3171_v35 = vld [vmem:[%s3409_s12 + $0x28] sm:$0xff]  }
 0xa98   :  { %v1885_v25 = vpack.c.bf16 %v1884_v18, %v1884_v18  ;;  %v3172_v18 = vld [vmem:[%s3409_s12 + $0x30] ss:$0 sps:$4 sm:$0x33]  }
 0xa9a   :  { %2001 = vmatmul.mubr.bf16.vlgmr.msra.gmra.mrb[32].mxu0 %v1885_v25  ;;  %v2461_v25 = vsel %vm2459_vm10, %v3172_v18, 0 }
 0xa9b   :  { %2945 = vmatprep.mubr.msk.bf16.mxu0 %vm3248_vm3, %v3249_v43  ;;  %2932 = vmatpush3.bf16.msra.mxu0 %v3166_v42 }
 0xa9c   :  { %2933 = vmatprep.subr.bf16.mxu0 %v3249_v43 }
 0xa9f   :  { %2934 = vmatpush3.bf16.msra.mxu0 %v3167_v45 }
 0xaa0   :  { %2935 = vmatprep.subr.bf16.mxu0 %v3249_v43 }
 0xaa3   :  { %2936 = vmatpush3.bf16.msra.mxu0 %v3168_v51 }
 0xaa4   :  { %2937 = vmatprep.subr.bf16.mxu0 %v3249_v43 }
 0xaa7   :  { %2938 = vmatpush3.bf16.msra.mxu0 %v3169_v19 }
 0xaa8   :  { %2939 = vmatprep.subr.bf16.mxu0 %v3249_v43 }
 0xaab   :  { %2940 = vmatpush3.bf16.msra.mxu0 %v3170_v56 }
 0xaac   :  { %2941 = vmatprep.subr.bf16.mxu0 %v3249_v43 }
 0xaaf   :  { %2942 = vmatpush3.bf16.msra.mxu0 %v3171_v35 }
 0xab0   :  { %2943 = vmatprep.subr.bf16.mxu0 %v3249_v43 }
 0xab3   :  { %2944 = vmatpush3.bf16.msra.mxu0 %v2461_v25 }
 0xb6d   :  { %v2002_v58 = vpop.f32.mrb[32].mxu0 }
 0xb6e   :  { %v2003_v26 = vadd.f32 %v2625_v44, %v2002_v58  ;;  %v2004_v27 = vpop.f32.mrb[33].mxu0  ;;  %v2645_v44 = vld [vmem:[%s3404_s4] ss:$0 sm:$0xff] }
 0xb6f   :  { %v2005_v59 = vpop.f32.mrb[34].mxu0 }
 0xb70   :  { %v2010_v30 = vsel %vm231_vm0, %v2003_v26, 0.0  ;;  %v2006_v15 = vpop.f32.mrb[35].mxu0 }
 0xb71   :  { %v2011_v60 = vrot.slane %v2010_v30, 4 }
 0xb73   :  { %v2012_v61 = vadd.f32 %v2011_v60, %v2010_v30 }
 0xb75   :  { %v2013_v29 = vrot.slane %v2012_v61, 2 }
 0xb77   :  { %v2014_v6 = vadd.f32 %v2013_v29, %v2012_v61  ;;  %v2654_v61 = vld [vmem:[%s3414_s6] ss:$0 sm:$0xff]  ;;  %s3250_s6 = smov [#allocation2]  }
 0xb78   :  { %s2522_s12 = sshll.u32 %s3250_s6, 4  ;;  %s2523_s12 = int_to_ptr.vmem [resolvable:$true] %s2522_s12 }
 0xb79   :  { %v2015_v55 = vrot.slane %v2014_v6, 1  ;;  %s3187_s4 = scalar_lea.vmem %s2523_s12, 32  ;;  %p3192_p1 = scmp.lt.s32.totalorder %s2523_s12, %s2523_s12 }
 0xb7a   :  { %p3188_p0 = scmp.ne.s32.totalorder %s2523_s12, %s3187_s4  ;;  %p3193_p2 = scmp.lt.s32.totalorder %s3187_s4, %s3187_s4 }
 0xb7b   :  { %v2016_v8 = vadd.f32 %v2015_v55, %v2014_v6 }
 0xb7c   :  { %p3194_p3 = por %p3193_p2, %p3192_p1 }
 0xb7d   :  { %v2018_v5 = vmul.f32 0.125, %v2016_v8 }
 0xb7e   :  { %p3195_p4 = pnand %p3194_p3, %p3188_p0 }
 0xb7f   :  { %v2019_v49 = vsub.f32 %v2003_v26, %v2018_v5 }
 0xb81   :  { %v2020_v62 = vmul.f32 %v2019_v49, %v2019_v49 }
 0xb83   :  { %v2021_v63 = vsel %vm231_vm0, %v2020_v62, 0.0 }
 0xb84   :  { %v2022_v0 = vrot.slane %v2021_v63, 4 }
 0xb86   :  { %v2023_v1 = vadd.f32 %v2022_v0, %v2021_v63 }
 0xb88   :  { %v2024_v50 = vrot.slane %v2023_v1, 2 }
 0xb8a   :  { %v2025_v28 = vadd.f32 %v2024_v50, %v2023_v1 }
 0xb8c   :  { %v2026_v9 = vrot.slane %v2025_v28, 1 }
 0xb8e   :  { %v2027_v2 = vadd.f32 %v2026_v9, %v2025_v28 }
 0xb90   :  { %v2028_v10 = vmul.f32 0.125, %v2027_v2 }
 0xb92   :  { %v2029_v11 = vadd.f32 1e-05, %v2028_v10 }
 0xb94   :  { %3181 = vrsqrt.f32 %v2029_v11 }
 0xb9e   :  { %v3182_v14 = vpop.eup %3181 }
 0xb9f   :  { %v2031_v7 = vmul.f32 %v3182_v14, %v2008_v13 }
 0xba1   :  { %v2036_v16 = vrot.slane %v2031_v7, %v3559_v46  ;;  %v2124_v46 = vld [vmem:[%s4105_s28] sm:$0x3] }
 0xba3   :  { %v2038_v20 = vmul.f32 %v2036_v16, %v2019_v49 }
 0xba5   :  { %v2045_v52 = vadd.f32 %v2639_v17, %v2038_v20 }
 0xba7   :  { %v2046_v22 = vmax.f32 %v2045_v52, 0.0 }
 0xba9   :  { %v2048_v23 = vrot.slane %v2046_v22, 1 }
 0xbab   :  { %v2049_v24 = vmax.f32 %v2046_v22, %v2048_v23 }
 0xbad   :  { %2897 = vmatpush3.msra.mxu1 %v2049_v24 }
 0xbae   :  { %2899 = vmatmul.mubr.msk.f32.vlgmr.msra.gmra.mrb[14].mxu1 %vm2050_vm7, %v2047_v33  ;;  %2901 = vmatprep.subr.mxu1 %v3249_v43 }
 0xbaf   :  { %2903 = vmatprep.mubr.msk.f32.mxu1 %vm3248_vm3, %v3249_v43 }
 0xc81   :  { %v2120_v3 = vpop.f32.mrb[14].mxu1 }
 0xc82   :  { %2902 = vmatpush3.msk.msra.mxu1 %vm2129_vm8, %v2120_v3  ;;  %v2900_v32 = vpop.f32.mrb[15].mxu1 }
 0xc83   :  { %2904 = vmatmul.mubr.msk.f32.vlgmr.msra.gmra.mrb[20].mxu1 %vm2125_vm9, %v2124_v46  ;;  %2906 = vmatprep.subr.mxu1 %v3249_v43 }
 0xc84   :  { %2907 = vmatpush3.msk.msra.mxu1 %vm2129_vm8, %v2120_v3  ;;  %2908 = vmatprep.mubr.msk.f32.mxu1 %vm3248_vm3, %v3249_v43 }
 0xc85   :  { %2911 = vmatprep.subr.bf16.mxu1 %v3249_v43 }
 0xc87   :  { %2909 = vmatmul.mubr.msk.f32.vlgmr.msra.gmra.mrb[22].mxu1 %vm2125_vm9, %v2203_v12 }
 0xc88   :  { %2927 = vmatprep.mubr.msk.bf16.mxu1 %vm3248_vm3, %v3249_v43  ;;  %2912 = vmatpush3.bf16.msra.mxu1 %v3158_v38 }
 0xc89   :  { %2913 = vmatprep.subr.bf16.mxu1 %v3249_v43 }
 0xc8c   :  { %2914 = vmatpush3.bf16.msra.mxu1 %v3159_v31 }
 0xc8d   :  { %2915 = vmatprep.subr.bf16.mxu1 %v3249_v43 }
 0xc90   :  { %2916 = vmatpush3.bf16.msra.mxu1 %v3160_v37 }
 0xc91   :  { %2917 = vmatprep.subr.bf16.mxu1 %v3249_v43 }
 0xc94   :  { %2918 = vmatpush3.bf16.msra.mxu1 %v3161_v4 }
 0xc95   :  { %2919 = vmatprep.subr.bf16.mxu1 %v3249_v43 }
 0xc98   :  { %2920 = vmatpush3.bf16.msra.mxu1 %v3162_v39 }
 0xc99   :  { %2921 = vmatprep.subr.bf16.mxu1 %v3249_v43 }
 0xc9c   :  { %2922 = vmatpush3.bf16.msra.mxu1 %v3163_v40 }
 0xc9d   :  { %2923 = vmatprep.subr.bf16.mxu1 %v3249_v43 }
 0xca0   :  { %2924 = vmatpush3.bf16.msra.mxu1 %v3164_v34 }
 0xca1   :  { %2925 = vmatprep.subr.bf16.mxu1 %v3249_v43 }
 0xca4   :  { %2926 = vmatpush3.bf16.msra.mxu1 %v3165_v41 }
 0xd56   :  { %v2199_v47 = vpop.f32.mrb[20].mxu1 }
 0xd57   :  { %v2905_v48 = vpop.f32.mrb[21].mxu1 }
 0xd5a   :  { %v2273_v53 = vpop.f32.mrb[22].mxu1 }
 0xd5b   :  { %2278 = vrot.lane.b32.xlu0 %v2273_v53, %s3245_s9  ;;  %v2910_v54 = vpop.f32.mrb[23].mxu1 }
 0xdcd   :  { %v2279_v57 = vpop.permute.xlu0 %2278 }
 0xdce   :  { %v2281_v36 = vsel %vm231_vm0, %v2199_v47, %v2279_v57  ;;  %vm2503_vm0 = vcmask 74752  }
 0xdcf   :  { %v2282_v21 = vpack.c.bf16 %v2281_v36, %v2281_v36 }
 0xdd1   :  { %2928 = vmatmul.mubr.bf16.vlgmr.msra.gmra.mrb[24].mxu1 %v2282_v21 }
 0xea4   :  { %v2388_v58 = vpop.f32.mrb[24].mxu1 }
 0xea5   :  { %v2389_v26 = vadd.f32 %v2645_v44, %v2388_v58  ;;  %v2929_v27 = vpop.f32.mrb[25].mxu1 }
 0xea6   :  { %v2391_v59 = vpop.f32.mrb[26].mxu1 }
 0xea7   :  { %v2394_v30 = vmax.f32 %v2389_v26, 0.0  ;;  %v2930_v15 = vpop.f32.mrb[27].mxu1 }
 0xea9   :  { %v2395_v60 = vpack.c.bf16 %v2394_v30, %v2394_v30 }
 0xeab   :  { %2946 = vmatmul.mubr.msk.bf16.vlgmr.msra.gmra.mrb[36].mxu0 %vm2455_vm11, %v2395_v60 }
 0xf7e   :  { %v2497_v29 = vpop.f32.mrb[36].mxu0 }
 0xf7f   :  { %v2498_v6 = vadd.f32 %v2654_v61, %v2497_v29  ;;  %v2947_v55 = vpop.f32.mrb[37].mxu0 }
 0xf80   :  { %v2500_v8 = vpop.f32.mrb[38].mxu0 }
 0xf81   :  { %v2948_v5 = vpop.f32.mrb[39].mxu0  ;;  %v2504_v43 = vsel %vm2503_vm0, %v2498_v6, -inf }
 0xf82   :  { %2505 = vmax.xlane.f32.xlu1 %v2504_v43 }
0x100f   :  { %v2506_v49 = vpop.xlane.xlu1 %2505 }
0x1010   :  { %v2507_v62 = vsub.f32 %v2498_v6, %v2506_v49 }
0x1012   :  { %v2508_v63 = vmul.f32 1.442695, %v2507_v62 }
0x1014   :  { %3183 = vpow2.f32 %v2508_v63 }
0x101e   :  { %v3184_v0 = vpop.eup %3183 }
0x101f   :  { %v2510_v1 = vsel %vm2503_vm0, %v3184_v0, 0.0 }
0x1020   :  { %2511 = vadd.xlane.f32.xlu0 %v2510_v1 }
0x10ad   :  { %v2512_v50 = vpop.xlane.xlu0 %2511 }
0x10ae   :  { %3185 = vrcp.f32 %v2512_v50 }
0x10b8   :  { %v3186_v28 = vpop.eup %3185 }
0x10b9   :  { %v2514_v9 = vmul.f32 %v3186_v28, %v3184_v0 }
0x10bb   :  { %2515 = vst.msk [vmem:[#allocation2] sm:$0x3] %vm2503_vm0, %v2514_v9 }
0x10bc   :  { %3198 = shalt.err (!%p3195_p4)
}
0x10bd   :  { %s3199_s7 = scalar_lea.hbm %s3419_s27, 32 }
0x10be   :  { %p3200_p5 = scmp.ne.s32.totalorder %s3419_s27, %s3199_s7  ;;  %p3203_p6 = scmp.lt.u32.totalorder %s3199_s7, %s3419_s27 }
0x10c0   :  { %p3205_p7 = pnand %p3203_p6, %p3200_p5 }
0x10c2   :  { %3208 = shalt.err (!%p3205_p7)
}
0x10c3   :  { %2525 = dma.vmem_to_hbm [thread:$0]  %s2523_s12, 32, %s3419_s27, [#allocation3]  }
0x10c4   :  { %3209 = dma.done.wait [#allocation3], 32  }
0x10c5   :  { %3210 = vsyncadd [#allocation3], 4294967264 }
0x10c6   :  { %2529 = vsyncpa [#allocation3], 1 }

</bundles_post_ra>
